<compile_context>
chip_gen: v7x
topology: tpu7x:2x2x1
jax: 0.10.0
libtpu: 0.0.40
codegen_flags: <defaults>
</compile_context>

<pallas_src>
import functools

import jax
import jax.numpy as jnp
import numpy as np
from jax import lax
from jax.experimental import pallas as pl
from jax.experimental.pallas import tpu as pltpu

BN_EPS = 1e-5
_VMEM_LIMIT = 32 * 1024 * 1024   # explicit VMEM budget; safe on v5e/v6e/v7x scoped limits


# ---------------- kernel A: pads -> conv -> pool-pad -> maxpool -> relu (+ BN statistics) ----------------

def _conv_pool_stats_kernel(x_ref, w_ref, b_ref, selw_ref, selh_ref,
                            o_ref, sum_ref, sumsq_ref, *,
                            nb, kh, kw, cin, cout, ph, pw, sh, sw,
                            pool_pad, skip_pool):
    """Processes `nb` samples per grid step in the packed, lane-dense (H, W*C) layout."""
    step = pl.program_id(0)

    # BN statistic accumulators are resident output blocks (same block index every step).
    @pl.when(step == 0)
    def _():
        sum_ref[...] = jnp.zeros_like(sum_ref)
        sumsq_ref[...] = jnp.zeros_like(sumsq_ref)

    H = x_ref.shape[1]
    W = x_ref.shape[2] // cin
    Wp = W + kw - 1                      # angular-padded width
    pb = (kh - 1) // 2                   # replication rows (bottom)
    pt = kh // 2                         # circular rows (top)
    Hc, Wc = H, W                        # 'same'-style conv output spatial dims
    Win = Wc + pool_pad                  # pool input width
    Lout = o_ref.shape[2]

    s_acc = jnp.zeros((1, Lout), jnp.float32)
    ss_acc = jnp.zeros((1, Lout), jnp.float32)

    for i in range(nb):
        x = x_ref[i]                                                 # (H, W*Cin) bf16
        # exnn.PeriodicPad2d(pad_left=kw-1): wrap the last kw-1 columns to the left.
        if kw > 1:
            x = jnp.concatenate([x[:, (W - (kw - 1)) * cin:], x], axis=1)
        # nn.ReplicationPad2d((0,0,0,pb)): replicate the last row.
        if pb > 0:
            x = jnp.concatenate([x] + [x[H - 1:H]] * pb, axis=0)
        # CircularPad(pt): prepend the first rows with their (padded-width) halves swapped.
        if pt > 0:
            split = (Wp // 2) * cin
            top = jnp.concatenate([x[:pt, split:], x[:pt, :split]], axis=1)
            x = jnp.concatenate([top, x], axis=0)

        # Conv2d as ONE banded matmul: K = kh*Wp*Cin, output stays packed as (Hc, Wc*Cout).
        patch = jnp.concatenate([x[dy:dy + Hc] for dy in range(kh)], axis=1)
        y = jnp.dot(patch, w_ref[...], preferred_element_type=jnp.float32) + b_ref[...]

        # exnn.PeriodicPad2d(pad_left=pw-sw) before the pool.
        if pool_pad > 0:
            y = jnp.concatenate([y[:, (Wc - pool_pad) * cout:], y], axis=1)

        # nn.MaxPool2d((ph,pw), stride=(sh,sw)).
        if not skip_pool:
            Hd = Hc - ph + 1
            Wd = Win - pw + 1
            Ho = (Hc - ph) // sh + 1
            dmax = None
            for dy in range(ph):                 # dense tap max: contiguous shifted slices only
                for dx in range(pw):
                    win = y[dy:dy + Hd, dx * cout: dx * cout + Wd * cout]
                    dmax = win if dmax is None else jnp.maximum(dmax, win)
            # stride decimation via 0/1 selection matmuls (keeps lanes dense, uses the MXU)
            dmax = jnp.dot(dmax, selw_ref[...], preferred_element_type=jnp.float32)
            if sh > 1:
                dmax = jnp.dot(selh_ref[...], dmax, preferred_element_type=jnp.float32)
            else:
                dmax = dmax[:Ho]
            y = dmax

        # ReLU; emit bf16 activation; accumulate BN sum / sum-of-squares in f32.
        r16 = jnp.maximum(y, 0.0).astype(o_ref.dtype)
        o_ref[i] = r16
        rf = r16.astype(jnp.float32)
        s_acc = s_acc + jnp.sum(rf, axis=0, keepdims=True)
        ss_acc = ss_acc + jnp.sum(rf * rf, axis=0, keepdims=True)

    sum_ref[...] += s_acc
    sumsq_ref[...] += ss_acc


# ------------------------------- kernel B: BatchNorm apply (scale/shift) -------------------------------

def _bn_apply_kernel(x_ref, scale_ref, shift_ref, o_ref):
    o_ref[...] = (x_ref[...].astype(jnp.float32) * scale_ref[...]
                  + shift_ref[...]).astype(o_ref.dtype)


# ------------------------------------------- wrapper helpers -------------------------------------------

def _banded_conv_weight(w, Wp, Wc):
    """(Cout,Cin,kh,kw) -> block-Toeplitz (kh*Wp*Cin, Wc*Cout) bf16 matrix for the packed matmul."""
    Cout, Cin, kh, kw = w.shape
    wt = jnp.transpose(w, (2, 3, 1, 0)).astype(jnp.float32)        # (kh, kw, Cin, Cout)
    sel = np.zeros((kw, Wp, Wc), np.float32)
    for dx in range(kw):
        sel[dx, np.arange(Wc) + dx, np.arange(Wc)] = 1.0
    sel = jnp.asarray(sel)
    # big[dy, wp, ci, wc, co] = wt[dy, wp-wc, ci, co] if 0 <= wp-wc < kw else 0   (exact 0/1 select)
    big = (wt[:, :, None, :, None, :] * sel[None, :, :, None, :, None]).sum(axis=1)
    return big.reshape(kh * Wp * Cin, Wc * Cout).astype(jnp.bfloat16)


def _pool_select_w(Wd, Wo, sw, cout):
    S = np.zeros((Wd * cout, Wo * cout), np.float32)
    eye = np.eye(cout, dtype=np.float32)
    for wo in range(Wo):
        wd = wo * sw
        S[wd * cout:(wd + 1) * cout, wo * cout:(wo + 1) * cout] = eye
    return jnp.asarray(S)


def _pool_select_h(Hd, Ho, sh):
    S = np.zeros((Ho, Hd), np.float32)
    S[np.arange(Ho), np.arange(Ho) * sh] = 1.0
    return jnp.asarray(S)


def _pick_block_batch(n, max_nb=8):
    nb = 1
    for c in range(1, min(n, max_nb) + 1):
        if n % c == 0:
            nb = c
    return nb


# --------------------------------------------- layer wrapper -------------------------------------------

def fused_polar_conv_layer(x_packed, w, b, gamma, beta, pool_k, pool_s):
    """One [pads -> conv -> pad -> maxpool -> relu -> batchnorm] block on packed (N, H, W*C) bf16."""
    N, H, WCin = x_packed.shape
    Cout, Cin, kh, kw = w.shape
    assert WCin % Cin == 0
    W = WCin // Cin
    ph, pw = pool_k
    sh, sw = pool_s
    pool_pad = pw - sw
    assert pool_pad >= 0, "PeriodicPad2d with negative pad (pool stride > pool kernel) unsupported"
    skip_pool = (ph == 1 and pw == 1)

    Wp = W + kw - 1
    Hc, Wc = H, W
    Win = Wc + pool_pad
    if skip_pool:
        Ho, Wo = Hc, Win
    else:
        Ho = (Hc - ph) // sh + 1
        Wo = (Win - pw) // sw + 1
    Lc, Lout = Wc * Cout, Wo * Cout
    K = kh * Wp * Cin

    w_big = _banded_conv_weight(w, Wp, Wc)                               # (K, Lc) bf16
    b_tile = jnp.tile(b.astype(jnp.float32), (Wc,)).reshape(1, Lc)       # (1, Lc)  f32
    if not skip_pool:
        Hd, Wd = Hc - ph + 1, Win - pw + 1
        sel_w = _pool_select_w(Wd, Wo, sw, Cout)
        sel_h = _pool_select_h(Hd, Ho, sh) if sh > 1 else jnp.zeros((1, 1), jnp.float32)
    else:
        sel_w = jnp.zeros((1, 1), jnp.float32)
        sel_h = jnp.zeros((1, 1), jnp.float32)

    nb = _pick_block_batch(N)
    kernel_a = functools.partial(
        _conv_pool_stats_kernel, nb=nb, kh=kh, kw=kw, cin=Cin, cout=Cout,
        ph=ph, pw=pw, sh=sh, sw=sw, pool_pad=pool_pad, skip_pool=skip_pool)

    act, bn_sum, bn_sumsq = pl.pallas_call(
        kernel_a,
        grid=(N // nb,),
        out_shape=(jax.ShapeDtypeStruct((N, Ho, Lout), jnp.bfloat16),
                   jax.ShapeDtypeStruct((1, Lout), jnp.float32),
                   jax.ShapeDtypeStruct((1, Lout), jnp.float32)),
        in_specs=[
            pl.BlockSpec((nb, H, WCin), lambda n: (n, 0, 0)),       # streamed input tiles (bf16)
            pl.BlockSpec((K, Lc), lambda n: (0, 0)),                # banded conv weights (resident)
            pl.BlockSpec((1, Lc), lambda n: (0, 0)),                # lane-tiled bias
            pl.BlockSpec(sel_w.shape, lambda n: (0, 0)),            # W-decimation selector
            pl.BlockSpec(sel_h.shape, lambda n: (0, 0)),            # H-decimation selector
        ],
        out_specs=(
            pl.BlockSpec((nb, Ho, Lout), lambda n: (n, 0, 0)),      # streamed pre-BN activations
            pl.BlockSpec((1, Lout), lambda n: (0, 0)),              # resident BN sum accumulator
            pl.BlockSpec((1, Lout), lambda n: (0, 0)),              # resident BN sumsq accumulator
        ),
        compiler_params=pltpu.CompilerParams(
            dimension_semantics=("arbitrary",),                     # BN stats accumulate across steps
            vmem_limit_bytes=_VMEM_LIMIT),
    )(x_packed, w_big, b_tile, sel_w, sel_h)

    # BatchNorm2d (training-mode batch statistics): tiny per-channel reduction in the wrapper.
    # TODO(synk): running_mean / running_var buffers (momentum=0.01) are not updated; only the
    #             training-mode forward with batch statistics is modeled.
    cnt = float(N * Ho * Wo)
    ch_sum = bn_sum.reshape(Wo, Cout).sum(axis=0)
    ch_ssq = bn_sumsq.reshape(Wo, Cout).sum(axis=0)
    mean = ch_sum / cnt
    var = ch_ssq / cnt - mean * mean
    scale = gamma.astype(jnp.float32) * lax.rsqrt(var + BN_EPS)
    shift = beta.astype(jnp.float32) - mean * scale
    scale_p = jnp.tile(scale, (Wo,)).reshape(1, Lout)
    shift_p = jnp.tile(shift, (Wo,)).reshape(1, Lout)

    out = pl.pallas_call(
        _bn_apply_kernel,
        grid=(N,),
        out_shape=jax.ShapeDtypeStruct((N, Ho, Lout), jnp.bfloat16),
        in_specs=[pl.BlockSpec((1, Ho, Lout), lambda n: (n, 0, 0)),
                  pl.BlockSpec((1, Lout), lambda n: (0, 0)),
                  pl.BlockSpec((1, Lout), lambda n: (0, 0))],
        out_specs=pl.BlockSpec((1, Ho, Lout), lambda n: (n, 0, 0)),
        compiler_params=pltpu.CompilerParams(
            dimension_semantics=("parallel",),                      # shards across v7x's 2 TCs
            vmem_limit_bytes=_VMEM_LIMIT),
    )(act, scale_p, shift_p)

    return out, Ho, Wo, Cout


# --------------------------------------------- network -------------------------------------------------

@functools.partial(jax.jit, static_argnames=("kernel_sizes_pool", "strides_pool"))
def cnn_in_polar_coords(x_nchw, params, kernel_sizes_pool, strides_pool):
    N, C, H, W = x_nchw.shape
    # NCHW -> packed lane-dense (N, H, W*C) bf16, once for the whole network.
    x = jnp.transpose(x_nchw, (0, 2, 3, 1)).reshape(N, H, W * C).astype(jnp.bfloat16)
    for layer, (w, b, gamma, beta) in enumerate(params):
        x, H, W, C = fused_polar_conv_layer(x, w, b, gamma, beta,
                                            kernel_sizes_pool[layer], strides_pool[layer])
    # packed -> NCHW f32, once.
    out = x.reshape(N, H, W, C)
    return jnp.transpose(out, (0, 3, 1, 2)).astype(jnp.float32)


# -------------------------------- pure-JAX reference (verification) ------------------------------------

def _periodic_pad_left_nchw(x, pad):
    if pad == 0:
        return x
    return jnp.concatenate([x[:, :, :, -pad:], x], axis=3)


def _round_bf16(x):
    return x.astype(jnp.bfloat16).astype(jnp.float32)


def reference_forward(x, params, kernel_sizes_pool, strides_pool):
    """NCHW reference mirroring the PyTorch nn.Sequential; bf16 rounding points match the kernel
    pipeline (bf16 MXU conv inputs, bf16 pre-BN activation storage, bf16 inter-layer outputs)."""
    for layer, (w, b, gamma, beta) in enumerate(params):
        kh, kw = w.shape[2], w.shape[3]
        xp = _periodic_pad_left_nchw(x, kw - 1)
        pb = (kh - 1) // 2
        if pb:
            xp = jnp.concatenate([xp] + [xp[:, :, -1:, :]] * pb, axis=2)
        pt = kh // 2
        if pt:
            Wp = xp.shape[3]
            top = jnp.concatenate([xp[:, :, :pt, Wp // 2:], xp[:, :, :pt, :Wp // 2]], axis=3)
            xp = jnp.concatenate([top, xp], axis=2)
        y = lax.conv_general_dilated(
            xp.astype(jnp.bfloat16), w.astype(jnp.bfloat16), (1, 1), 'VALID',
            dimension_numbers=('NCHW', 'OIHW', 'NCHW'),
            preferred_element_type=jnp.float32) + b[None, :, None, None]
        ph, pw = kernel_sizes_pool[layer]
        sh, sw = strides_pool[layer]
        yp = _periodic_pad_left_nchw(y, pw - sw)
        if not all(k == 1 for k in kernel_sizes_pool[layer]):
            yp = lax.reduce_window(yp, -jnp.inf, lax.max,
                                   (1, 1, ph, pw), (1, 1, sh, sw), 'VALID')
        yr = _round_bf16(jnp.maximum(yp, 0.0))            # kernel stores the pre-BN act in bf16
        mean = jnp.mean(yr, axis=(0, 2, 3), keepdims=True)
        var = jnp.mean((yr - mean) ** 2, axis=(0, 2, 3), keepdims=True)
        xn = ((yr - mean) * lax.rsqrt(var + BN_EPS) * gamma[None, :, None, None]
              + beta[None, :, None, None])
        x = _round_bf16(xn)                               # inter-layer activations are bf16
    return x


# --------------------------------------------------- main ----------------------------------------------

if __name__ == "__main__":
    # Module config (small; exercises both the even-pool and the overlapping-pool paths)
    kernel_sizes_conv2d = [(3, 3), (3, 5)]
    kernel_sizes_pool = ((2, 2), (3, 3))
    strides_pool = ((2, 2), (2, 2))
    kernel_dims = [4, 8, 16]

    key = jax.random.PRNGKey(0)
    key, xkey = jax.random.split(key)
    x = jax.random.normal(xkey, (2, kernel_dims[0], 16, 16), jnp.float32)

    # Deterministic parameter init (Conv2d weight/bias, BatchNorm2d gamma/beta).
    params = []
    for layer, (kh, kw) in enumerate(kernel_sizes_conv2d):
        cin, cout = kernel_dims[layer], kernel_dims[layer + 1]
        key, wk, bk, gk, bek = jax.random.split(key, 5)
        fan_in = cin * kh * kw
        w = jax.random.normal(wk, (cout, cin, kh, kw), jnp.float32) / np.sqrt(fan_in)
        b = 0.1 * jax.random.normal(bk, (cout,), jnp.float32)
        gamma = 1.0 + 0.1 * jax.random.normal(gk, (cout,), jnp.float32)
        beta = 0.1 * jax.random.normal(bek, (cout,), jnp.float32)
        params.append((w, b, gamma, beta))

    out = cnn_in_polar_coords(x, params,
                              kernel_sizes_pool=kernel_sizes_pool,
                              strides_pool=strides_pool)
    out = jax.block_until_ready(out)

    ref = reference_forward(x, params, kernel_sizes_pool, strides_pool)
    # Tolerance reflects intentional bf16 storage of weights/activations (per the perf review);
    # structural bugs would produce O(0.1 - 1) errors.
    np.testing.assert_allclose(np.asarray(out), np.asarray(ref), rtol=3e-2, atol=3e-2)
    print("KERNEL_OK")
</pallas_src>

<mosaic_0001>
module attributes {stable_mosaic.version = 11 : i64} {
  func.func @_conv_pool_stats_kernel(%arg0: i32, %arg1: memref<2x16x64xbf16, #tpu.memory_space<vmem>>, %arg2: memref<216x128xbf16, #tpu.memory_space<vmem>>, %arg3: memref<1x128xf32, #tpu.memory_space<vmem>>, %arg4: memref<120x64xf32, #tpu.memory_space<vmem>>, %arg5: memref<8x15xf32, #tpu.memory_space<vmem>>, %arg6: memref<2x8x64xbf16, #tpu.memory_space<vmem>>, %arg7: memref<1x64xf32, #tpu.memory_space<vmem>>, %arg8: memref<1x64xf32, #tpu.memory_space<vmem>>) attributes {dimension_semantics = [#tpu.dimension_semantics<arbitrary>], iteration_bounds = array<i64: 1>, scalar_prefetch = 0 : i64, scratch_operands = 0 : i64, tpu.core_type = #tpu.core_type<tc>, window_params = [{transform_indices = @transform_0, window_bounds = array<i64: 2, 16, 64>}, {pipeline_mode = #tpu.pipeline_mode<synchronous>, transform_indices = @transform_1, window_bounds = array<i64: 216, 128>}, {pipeline_mode = #tpu.pipeline_mode<synchronous>, transform_indices = @transform_2, window_bounds = array<i64: 1, 128>}, {pipeline_mode = #tpu.pipeline_mode<synchronous>, transform_indices = @transform_3, window_bounds = array<i64: 120, 64>}, {pipeline_mode = #tpu.pipeline_mode<synchronous>, transform_indices = @transform_4, window_bounds = array<i64: 8, 15>}, {transform_indices = @transform_5, window_bounds = array<i64: 2, 8, 64>}, {pipeline_mode = #tpu.pipeline_mode<synchronous>, transform_indices = @transform_6, window_bounds = array<i64: 1, 64>}, {pipeline_mode = #tpu.pipeline_mode<synchronous>, transform_indices = @transform_7, window_bounds = array<i64: 1, 64>}]} {
    %c0_i32 = arith.constant 0 : i32
    %0 = arith.cmpi eq, %arg0, %c0_i32 : i32
    %1 = arith.extui %0 : i1 to i32
    %c0_i32_0 = arith.constant 0 : i32
    %2 = arith.cmpi ne, %1, %c0_i32_0 : i32
    scf.if %2 {
      %cst_48 = arith.constant 0.000000e+00 : f32
      %99 = vector.broadcast %cst_48 : f32 to vector<1x64xf32>
      %c0_49 = arith.constant 0 : index
      %c0_50 = arith.constant 0 : index
      %100 = vector.load %arg7[%c0_49, %c0_50] : memref<1x64xf32, #tpu.memory_space<vmem>>, vector<1x64xf32>
      tpu.vector_store %arg7[%c0_49, %c0_50], %99 {strides = array<i32>} : memref<1x64xf32, #tpu.memory_space<vmem>>, vector<1x64xf32>,
      %cst_51 = arith.constant 0.000000e+00 : f32
      %101 = vector.broadcast %cst_51 : f32 to vector<1x64xf32>
      %c0_52 = arith.constant 0 : index
      %c0_53 = arith.constant 0 : index
      %102 = vector.load %arg8[%c0_52, %c0_53] : memref<1x64xf32, #tpu.memory_space<vmem>>, vector<1x64xf32>
      tpu.vector_store %arg8[%c0_52, %c0_53], %101 {strides = array<i32>} : memref<1x64xf32, #tpu.memory_space<vmem>>, vector<1x64xf32>,
    } else {
    }
    %cst = arith.constant 0.000000e+00 : f32
    %3 = vector.broadcast %cst : f32 to vector<1x64xf32>
    %cst_1 = arith.constant 0.000000e+00 : f32
    %4 = vector.broadcast %cst_1 : f32 to vector<1x64xf32>
    %c0 = arith.constant 0 : index
    %c0_2 = arith.constant 0 : index
    %c0_3 = arith.constant 0 : index
    %5 = vector.load %arg1[%c0, %c0_2, %c0_3] : memref<2x16x64xbf16, #tpu.memory_space<vmem>>, vector<1x16x64xbf16>
    %6 = vector.shape_cast %5 : vector<1x16x64xbf16> to vector<16x64xbf16>
    %7 = vector.extract_strided_slice %6 {offsets = [0, 56], sizes = [16, 8], strides = [1, 1]} : vector<16x64xbf16> to vector<16x8xbf16>
    %8 = tpu.concatenate %7, %6 in 1 : vector<16x8xbf16>, vector<16x64xbf16> -> vector<16x72xbf16>
    %9 = vector.extract_strided_slice %8 {offsets = [15, 0], sizes = [1, 72], strides = [1, 1]} : vector<16x72xbf16> to vector<1x72xbf16>
    %10 = tpu.concatenate %8, %9 in 0 : vector<16x72xbf16>, vector<1x72xbf16> -> vector<17x72xbf16>
    %11 = vector.extract_strided_slice %10 {offsets = [0, 36], sizes = [1, 36], strides = [1, 1]} : vector<17x72xbf16> to vector<1x36xbf16>
    %12 = vector.extract_strided_slice %10 {offsets = [0, 0], sizes = [1, 36], strides = [1, 1]} : vector<17x72xbf16> to vector<1x36xbf16>
    %13 = tpu.concatenate %11, %12 in 1 : vector<1x36xbf16>, vector<1x36xbf16> -> vector<1x72xbf16>
    %14 = tpu.concatenate %13, %10 in 0 : vector<1x72xbf16>, vector<17x72xbf16> -> vector<18x72xbf16>
    %15 = vector.extract_strided_slice %14 {offsets = [0, 0], sizes = [16, 72], strides = [1, 1]} : vector<18x72xbf16> to vector<16x72xbf16>
    %16 = vector.extract_strided_slice %14 {offsets = [1, 0], sizes = [16, 72], strides = [1, 1]} : vector<18x72xbf16> to vector<16x72xbf16>
    %17 = vector.extract_strided_slice %14 {offsets = [2, 0], sizes = [16, 72], strides = [1, 1]} : vector<18x72xbf16> to vector<16x72xbf16>
    %18 = tpu.concatenate %15, %16, %17 in 1 : vector<16x72xbf16>, vector<16x72xbf16>, vector<16x72xbf16> -> vector<16x216xbf16>
    %c0_4 = arith.constant 0 : index
    %c0_5 = arith.constant 0 : index
    %19 = vector.load %arg2[%c0_4, %c0_5] : memref<216x128xbf16, #tpu.memory_space<vmem>>, vector<216x128xbf16>
    %cst_6 = arith.constant dense<0.000000e+00> : vector<16x128xf32>
    %20 = tpu.matmul %18, %19, %cst_6 {dimension_numbers = #tpu.dot_dimension_numbers<[1], [0], [0], [1], [0, 0, 1, 1], [], []>} : vector<16x216xbf16>, vector<216x128xbf16>, vector<16x128xf32> -> vector<16x128xf32>
    %c0_7 = arith.constant 0 : index
    %c0_8 = arith.constant 0 : index
    %21 = vector.load %arg3[%c0_7, %c0_8] : memref<1x128xf32, #tpu.memory_space<vmem>>, vector<1x128xf32>
    %22 = vector.broadcast %21 : vector<1x128xf32> to vector<16x128xf32>
    %23 = arith.addf %20, %22 : vector<16x128xf32>
    %24 = vector.extract_strided_slice %23 {offsets = [0, 0], sizes = [15, 120], strides = [1, 1]} : vector<16x128xf32> to vector<15x120xf32>
    %25 = vector.extract_strided_slice %23 {offsets = [0, 8], sizes = [15, 120], strides = [1, 1]} : vector<16x128xf32> to vector<15x120xf32>
    %26 = arith.maximumf %24, %25 : vector<15x120xf32>
    %27 = vector.extract_strided_slice %23 {offsets = [1, 0], sizes = [15, 120], strides = [1, 1]} : vector<16x128xf32> to vector<15x120xf32>
    %28 = arith.maximumf %26, %27 : vector<15x120xf32>
    %29 = vector.extract_strided_slice %23 {offsets = [1, 8], sizes = [15, 120], strides = [1, 1]} : vector<16x128xf32> to vector<15x120xf32>
    %30 = arith.maximumf %28, %29 : vector<15x120xf32>
    %c0_9 = arith.constant 0 : index
    %c0_10 = arith.constant 0 : index
    %31 = vector.load %arg4[%c0_9, %c0_10] : memref<120x64xf32, #tpu.memory_space<vmem>>, vector<120x64xf32>
    %cst_11 = arith.constant dense<0.000000e+00> : vector<15x64xf32>
    %32 = tpu.matmul %30, %31, %cst_11 {dimension_numbers = #tpu.dot_dimension_numbers<[1], [0], [0], [1], [0, 0, 1, 1], [], []>} : vector<15x120xf32>, vector<120x64xf32>, vector<15x64xf32> -> vector<15x64xf32>
    %c0_12 = arith.constant 0 : index
    %c0_13 = arith.constant 0 : index
    %33 = vector.load %arg5[%c0_12, %c0_13] : memref<8x15xf32, #tpu.memory_space<vmem>>, vector<8x15xf32>
    %cst_14 = arith.constant dense<0.000000e+00> : vector<8x64xf32>
    %34 = tpu.matmul %33, %32, %cst_14 {dimension_numbers = #tpu.dot_dimension_numbers<[1], [0], [0], [1], [0, 0, 1, 1], [], []>} : vector<8x15xf32>, vector<15x64xf32>, vector<8x64xf32> -> vector<8x64xf32>
    %cst_15 = arith.constant 0.000000e+00 : f32
    %35 = vector.broadcast %cst_15 : f32 to vector<8x64xf32>
    %36 = arith.maximumf %34, %35 : vector<8x64xf32>
    %37 = arith.truncf %36 : vector<8x64xf32> to vector<8x64xbf16>
    %c0_16 = arith.constant 0 : index
    %c0_17 = arith.constant 0 : index
    %c0_18 = arith.constant 0 : index
    %38 = vector.load %arg6[%c0_16, %c0_17, %c0_18] : memref<2x8x64xbf16, #tpu.memory_space<vmem>>, vector<1x8x64xbf16>
    %39 = vector.shape_cast %38 : vector<1x8x64xbf16> to vector<8x64xbf16>
    %40 = vector.shape_cast %37 : vector<8x64xbf16> to vector<1x8x64xbf16>
    tpu.vector_store %arg6[%c0_16, %c0_17, %c0_18], %40 {strides = array<i32>} : memref<2x8x64xbf16, #tpu.memory_space<vmem>>, vector<1x8x64xbf16>,
    %41 = arith.extf %37 : vector<8x64xbf16> to vector<8x64xf32>
    %cst_19 = arith.constant dense<0.000000e+00> : vector<64xf32>
    %42 = vector.multi_reduction <add>, %41, %cst_19 [0] : vector<8x64xf32> to vector<64xf32>
    %43 = vector.shape_cast %42 : vector<64xf32> to vector<1x64xf32>
    %44 = arith.addf %3, %43 : vector<1x64xf32>
    %45 = arith.mulf %41, %41 : vector<8x64xf32>
    %cst_20 = arith.constant dense<0.000000e+00> : vector<64xf32>
    %46 = vector.multi_reduction <add>, %45, %cst_20 [0] : vector<8x64xf32> to vector<64xf32>
    %47 = vector.shape_cast %46 : vector<64xf32> to vector<1x64xf32>
    %48 = arith.addf %4, %47 : vector<1x64xf32>
    %c1 = arith.constant 1 : index
    %c0_21 = arith.constant 0 : index
    %c0_22 = arith.constant 0 : index
    %49 = vector.load %arg1[%c1, %c0_21, %c0_22] : memref<2x16x64xbf16, #tpu.memory_space<vmem>>, vector<1x16x64xbf16>
    %50 = vector.shape_cast %49 : vector<1x16x64xbf16> to vector<16x64xbf16>
    %51 = vector.extract_strided_slice %50 {offsets = [0, 56], sizes = [16, 8], strides = [1, 1]} : vector<16x64xbf16> to vector<16x8xbf16>
    %52 = tpu.concatenate %51, %50 in 1 : vector<16x8xbf16>, vector<16x64xbf16> -> vector<16x72xbf16>
    %53 = vector.extract_strided_slice %52 {offsets = [15, 0], sizes = [1, 72], strides = [1, 1]} : vector<16x72xbf16> to vector<1x72xbf16>
    %54 = tpu.concatenate %52, %53 in 0 : vector<16x72xbf16>, vector<1x72xbf16> -> vector<17x72xbf16>
    %55 = vector.extract_strided_slice %54 {offsets = [0, 36], sizes = [1, 36], strides = [1, 1]} : vector<17x72xbf16> to vector<1x36xbf16>
    %56 = vector.extract_strided_slice %54 {offsets = [0, 0], sizes = [1, 36], strides = [1, 1]} : vector<17x72xbf16> to vector<1x36xbf16>
    %57 = tpu.concatenate %55, %56 in 1 : vector<1x36xbf16>, vector<1x36xbf16> -> vector<1x72xbf16>
    %58 = tpu.concatenate %57, %54 in 0 : vector<1x72xbf16>, vector<17x72xbf16> -> vector<18x72xbf16>
    %59 = vector.extract_strided_slice %58 {offsets = [0, 0], sizes = [16, 72], strides = [1, 1]} : vector<18x72xbf16> to vector<16x72xbf16>
    %60 = vector.extract_strided_slice %58 {offsets = [1, 0], sizes = [16, 72], strides = [1, 1]} : vector<18x72xbf16> to vector<16x72xbf16>
    %61 = vector.extract_strided_slice %58 {offsets = [2, 0], sizes = [16, 72], strides = [1, 1]} : vector<18x72xbf16> to vector<16x72xbf16>
    %62 = tpu.concatenate %59, %60, %61 in 1 : vector<16x72xbf16>, vector<16x72xbf16>, vector<16x72xbf16> -> vector<16x216xbf16>
    %c0_23 = arith.constant 0 : index
    %c0_24 = arith.constant 0 : index
    %63 = vector.load %arg2[%c0_23, %c0_24] : memref<216x128xbf16, #tpu.memory_space<vmem>>, vector<216x128xbf16>
    %cst_25 = arith.constant dense<0.000000e+00> : vector<16x128xf32>
    %64 = tpu.matmul %62, %63, %cst_25 {dimension_numbers = #tpu.dot_dimension_numbers<[1], [0], [0], [1], [0, 0, 1, 1], [], []>} : vector<16x216xbf16>, vector<216x128xbf16>, vector<16x128xf32> -> vector<16x128xf32>
    %c0_26 = arith.constant 0 : index
    %c0_27 = arith.constant 0 : index
    %65 = vector.load %arg3[%c0_26, %c0_27] : memref<1x128xf32, #tpu.memory_space<vmem>>, vector<1x128xf32>
    %66 = vector.broadcast %65 : vector<1x128xf32> to vector<16x128xf32>
    %67 = arith.addf %64, %66 : vector<16x128xf32>
    %68 = vector.extract_strided_slice %67 {offsets = [0, 0], sizes = [15, 120], strides = [1, 1]} : vector<16x128xf32> to vector<15x120xf32>
    %69 = vector.extract_strided_slice %67 {offsets = [0, 8], sizes = [15, 120], strides = [1, 1]} : vector<16x128xf32> to vector<15x120xf32>
    %70 = arith.maximumf %68, %69 : vector<15x120xf32>
    %71 = vector.extract_strided_slice %67 {offsets = [1, 0], sizes = [15, 120], strides = [1, 1]} : vector<16x128xf32> to vector<15x120xf32>
    %72 = arith.maximumf %70, %71 : vector<15x120xf32>
    %73 = vector.extract_strided_slice %67 {offsets = [1, 8], sizes = [15, 120], strides = [1, 1]} : vector<16x128xf32> to vector<15x120xf32>
    %74 = arith.maximumf %72, %73 : vector<15x120xf32>
    %c0_28 = arith.constant 0 : index
    %c0_29 = arith.constant 0 : index
    %75 = vector.load %arg4[%c0_28, %c0_29] : memref<120x64xf32, #tpu.memory_space<vmem>>, vector<120x64xf32>
    %cst_30 = arith.constant dense<0.000000e+00> : vector<15x64xf32>
    %76 = tpu.matmul %74, %75, %cst_30 {dimension_numbers = #tpu.dot_dimension_numbers<[1], [0], [0], [1], [0, 0, 1, 1], [], []>} : vector<15x120xf32>, vector<120x64xf32>, vector<15x64xf32> -> vector<15x64xf32>
    %c0_31 = arith.constant 0 : index
    %c0_32 = arith.constant 0 : index
    %77 = vector.load %arg5[%c0_31, %c0_32] : memref<8x15xf32, #tpu.memory_space<vmem>>, vector<8x15xf32>
    %cst_33 = arith.constant dense<0.000000e+00> : vector<8x64xf32>
    %78 = tpu.matmul %77, %76, %cst_33 {dimension_numbers = #tpu.dot_dimension_numbers<[1], [0], [0], [1], [0, 0, 1, 1], [], []>} : vector<8x15xf32>, vector<15x64xf32>, vector<8x64xf32> -> vector<8x64xf32>
    %cst_34 = arith.constant 0.000000e+00 : f32
    %79 = vector.broadcast %cst_34 : f32 to vector<8x64xf32>
    %80 = arith.maximumf %78, %79 : vector<8x64xf32>
    %81 = arith.truncf %80 : vector<8x64xf32> to vector<8x64xbf16>
    %c1_35 = arith.constant 1 : index
    %c0_36 = arith.constant 0 : index
    %c0_37 = arith.constant 0 : index
    %82 = vector.load %arg6[%c1_35, %c0_36, %c0_37] : memref<2x8x64xbf16, #tpu.memory_space<vmem>>, vector<1x8x64xbf16>
    %83 = vector.shape_cast %82 : vector<1x8x64xbf16> to vector<8x64xbf16>
    %84 = vector.shape_cast %81 : vector<8x64xbf16> to vector<1x8x64xbf16>
    tpu.vector_store %arg6[%c1_35, %c0_36, %c0_37], %84 {strides = array<i32>} : memref<2x8x64xbf16, #tpu.memory_space<vmem>>, vector<1x8x64xbf16>,
    %85 = arith.extf %81 : vector<8x64xbf16> to vector<8x64xf32>
    %cst_38 = arith.constant dense<0.000000e+00> : vector<64xf32>
    %86 = vector.multi_reduction <add>, %85, %cst_38 [0] : vector<8x64xf32> to vector<64xf32>
    %87 = vector.shape_cast %86 : vector<64xf32> to vector<1x64xf32>
    %88 = arith.addf %44, %87 : vector<1x64xf32>
    %89 = arith.mulf %85, %85 : vector<8x64xf32>
    %cst_39 = arith.constant dense<0.000000e+00> : vector<64xf32>
    %90 = vector.multi_reduction <add>, %89, %cst_39 [0] : vector<8x64xf32> to vector<64xf32>
    %91 = vector.shape_cast %90 : vector<64xf32> to vector<1x64xf32>
    %92 = arith.addf %48, %91 : vector<1x64xf32>
    %c0_40 = arith.constant 0 : index
    %c0_41 = arith.constant 0 : index
    %93 = vector.load %arg7[%c0_40, %c0_41] : memref<1x64xf32, #tpu.memory_space<vmem>>, vector<1x64xf32>
    %94 = arith.addf %93, %88 : vector<1x64xf32>
    %c0_42 = arith.constant 0 : index
    %c0_43 = arith.constant 0 : index
    %95 = vector.load %arg7[%c0_42, %c0_43] : memref<1x64xf32, #tpu.memory_space<vmem>>, vector<1x64xf32>
    tpu.vector_store %arg7[%c0_42, %c0_43], %94 {strides = array<i32>} : memref<1x64xf32, #tpu.memory_space<vmem>>, vector<1x64xf32>,
    %c0_44 = arith.constant 0 : index
    %c0_45 = arith.constant 0 : index
    %96 = vector.load %arg8[%c0_44, %c0_45] : memref<1x64xf32, #tpu.memory_space<vmem>>, vector<1x64xf32>
    %97 = arith.addf %96, %92 : vector<1x64xf32>
    %c0_46 = arith.constant 0 : index
    %c0_47 = arith.constant 0 : index
    %98 = vector.load %arg8[%c0_46, %c0_47] : memref<1x64xf32, #tpu.memory_space<vmem>>, vector<1x64xf32>
    tpu.vector_store %arg8[%c0_46, %c0_47], %97 {strides = array<i32>} : memref<1x64xf32, #tpu.memory_space<vmem>>, vector<1x64xf32>,
    return
  }
  func.func @transform_0(%arg0: i32) -> (i32, i32, i32) {
    %c0_i32 = arith.constant 0 : i32
    %c0_i32_0 = arith.constant 0 : i32
    %c0_i32_1 = arith.constant 0 : i32
    return %arg0, %c0_i32, %c0_i32_0 : i32, i32, i32
  }
  func.func @transform_1(%arg0: i32) -> (i32, i32) {
    %c0_i32 = arith.constant 0 : i32
    %c0_i32_0 = arith.constant 0 : i32
    %c0_i32_1 = arith.constant 0 : i32
    return %c0_i32, %c0_i32_0 : i32, i32
  }
  func.func @transform_2(%arg0: i32) -> (i32, i32) {
    %c0_i32 = arith.constant 0 : i32
    %c0_i32_0 = arith.constant 0 : i32
    %c0_i32_1 = arith.constant 0 : i32
    return %c0_i32, %c0_i32_0 : i32, i32
  }
  func.func @transform_3(%arg0: i32) -> (i32, i32) {
    %c0_i32 = arith.constant 0 : i32
    %c0_i32_0 = arith.constant 0 : i32
    %c0_i32_1 = arith.constant 0 : i32
    return %c0_i32, %c0_i32_0 : i32, i32
  }
  func.func @transform_4(%arg0: i32) -> (i32, i32) {
    %c0_i32 = arith.constant 0 : i32
    %c0_i32_0 = arith.constant 0 : i32
    %c0_i32_1 = arith.constant 0 : i32
    return %c0_i32, %c0_i32_0 : i32, i32
  }
  func.func @transform_5(%arg0: i32) -> (i32, i32, i32) {
    %c0_i32 = arith.constant 0 : i32
    %c0_i32_0 = arith.constant 0 : i32
    %c0_i32_1 = arith.constant 0 : i32
    return %arg0, %c0_i32, %c0_i32_0 : i32, i32, i32
  }
  func.func @transform_6(%arg0: i32) -> (i32, i32) {
    %c0_i32 = arith.constant 0 : i32
    %c0_i32_0 = arith.constant 0 : i32
    %c0_i32_1 = arith.constant 0 : i32
    return %c0_i32, %c0_i32_0 : i32, i32
  }
  func.func @transform_7(%arg0: i32) -> (i32, i32) {
    %c0_i32 = arith.constant 0 : i32
    %c0_i32_0 = arith.constant 0 : i32
    %c0_i32_1 = arith.constant 0 : i32
    return %c0_i32, %c0_i32_0 : i32, i32
  }
}

module attributes {stable_mosaic.version = 11 : i64} {
  func.func @_bn_apply_kernel(%arg0: i32, %arg1: memref<1x8x64xbf16, #tpu.memory_space<vmem>>, %arg2: memref<1x64xf32, #tpu.memory_space<vmem>>, %arg3: memref<1x64xf32, #tpu.memory_space<vmem>>, %arg4: memref<1x8x64xbf16, #tpu.memory_space<vmem>>) attributes {dimension_semantics = [#tpu.dimension_semantics<parallel>], iteration_bounds = array<i64: 2>, scalar_prefetch = 0 : i64, scratch_operands = 0 : i64, tpu.core_type = #tpu.core_type<tc>, window_params = [{transform_indices = @transform_0, window_bounds = array<i64: 1, 8, 64>}, {pipeline_mode = #tpu.pipeline_mode<synchronous>, transform_indices = @transform_1, window_bounds = array<i64: 1, 64>}, {pipeline_mode = #tpu.pipeline_mode<synchronous>, transform_indices = @transform_2, window_bounds = array<i64: 1, 64>}, {transform_indices = @transform_3, window_bounds = array<i64: 1, 8, 64>}]} {
    %c0 = arith.constant 0 : index
    %c0_0 = arith.constant 0 : index
    %c0_1 = arith.constant 0 : index
    %0 = vector.load %arg1[%c0, %c0_0, %c0_1] : memref<1x8x64xbf16, #tpu.memory_space<vmem>>, vector<1x8x64xbf16>
    %1 = arith.extf %0 : vector<1x8x64xbf16> to vector<1x8x64xf32>
    %c0_2 = arith.constant 0 : index
    %c0_3 = arith.constant 0 : index
    %2 = vector.load %arg2[%c0_2, %c0_3] : memref<1x64xf32, #tpu.memory_space<vmem>>, vector<1x64xf32>
    %3 = vector.shape_cast %2 : vector<1x64xf32> to vector<1x1x64xf32>
    %4 = vector.broadcast %3 : vector<1x1x64xf32> to vector<1x8x64xf32>
    %5 = arith.mulf %1, %4 : vector<1x8x64xf32>
    %c0_4 = arith.constant 0 : index
    %c0_5 = arith.constant 0 : index
    %6 = vector.load %arg3[%c0_4, %c0_5] : memref<1x64xf32, #tpu.memory_space<vmem>>, vector<1x64xf32>
    %7 = vector.shape_cast %6 : vector<1x64xf32> to vector<1x1x64xf32>
    %8 = vector.broadcast %7 : vector<1x1x64xf32> to vector<1x8x64xf32>
    %9 = arith.addf %5, %8 : vector<1x8x64xf32>
    %10 = arith.truncf %9 : vector<1x8x64xf32> to vector<1x8x64xbf16>
    %c0_6 = arith.constant 0 : index
    %c0_7 = arith.constant 0 : index
    %c0_8 = arith.constant 0 : index
    %11 = vector.load %arg4[%c0_6, %c0_7, %c0_8] : memref<1x8x64xbf16, #tpu.memory_space<vmem>>, vector<1x8x64xbf16>
    tpu.vector_store %arg4[%c0_6, %c0_7, %c0_8], %10 {strides = array<i32>} : memref<1x8x64xbf16, #tpu.memory_space<vmem>>, vector<1x8x64xbf16>,
    return
  }
  func.func @transform_0(%arg0: i32) -> (i32, i32, i32) {
    %c0_i32 = arith.constant 0 : i32
    %c0_i32_0 = arith.constant 0 : i32
    %c0_i32_1 = arith.constant 0 : i32
    return %arg0, %c0_i32, %c0_i32_0 : i32, i32, i32
  }
  func.func @transform_1(%arg0: i32) -> (i32, i32) {
    %c0_i32 = arith.constant 0 : i32
    %c0_i32_0 = arith.constant 0 : i32
    %c0_i32_1 = arith.constant 0 : i32
    return %c0_i32, %c0_i32_0 : i32, i32
  }
  func.func @transform_2(%arg0: i32) -> (i32, i32) {
    %c0_i32 = arith.constant 0 : i32
    %c0_i32_0 = arith.constant 0 : i32
    %c0_i32_1 = arith.constant 0 : i32
    return %c0_i32, %c0_i32_0 : i32, i32
  }
  func.func @transform_3(%arg0: i32) -> (i32, i32, i32) {
    %c0_i32 = arith.constant 0 : i32
    %c0_i32_0 = arith.constant 0 : i32
    %c0_i32_1 = arith.constant 0 : i32
    return %arg0, %c0_i32, %c0_i32_0 : i32, i32, i32
  }
}

module attributes {stable_mosaic.version = 11 : i64} {
  func.func @_conv_pool_stats_kernel(%arg0: i32, %arg1: memref<2x8x64xbf16, #tpu.memory_space<vmem>>, %arg2: memref<288x128xbf16, #tpu.memory_space<vmem>>, %arg3: memref<1x128xf32, #tpu.memory_space<vmem>>, %arg4: memref<112x64xf32, #tpu.memory_space<vmem>>, %arg5: memref<3x6xf32, #tpu.memory_space<vmem>>, %arg6: memref<2x3x64xbf16, #tpu.memory_space<vmem>>, %arg7: memref<1x64xf32, #tpu.memory_space<vmem>>, %arg8: memref<1x64xf32, #tpu.memory_space<vmem>>) attributes {dimension_semantics = [#tpu.dimension_semantics<arbitrary>], iteration_bounds = array<i64: 1>, scalar_prefetch = 0 : i64, scratch_operands = 0 : i64, tpu.core_type = #tpu.core_type<tc>, window_params = [{transform_indices = @transform_0, window_bounds = array<i64: 2, 8, 64>}, {pipeline_mode = #tpu.pipeline_mode<synchronous>, transform_indices = @transform_1, window_bounds = array<i64: 288, 128>}, {pipeline_mode = #tpu.pipeline_mode<synchronous>, transform_indices = @transform_2, window_bounds = array<i64: 1, 128>}, {pipeline_mode = #tpu.pipeline_mode<synchronous>, transform_indices = @transform_3, window_bounds = array<i64: 112, 64>}, {pipeline_mode = #tpu.pipeline_mode<synchronous>, transform_indices = @transform_4, window_bounds = array<i64: 3, 6>}, {transform_indices = @transform_5, window_bounds = array<i64: 2, 3, 64>}, {pipeline_mode = #tpu.pipeline_mode<synchronous>, transform_indices = @transform_6, window_bounds = array<i64: 1, 64>}, {pipeline_mode = #tpu.pipeline_mode<synchronous>, transform_indices = @transform_7, window_bounds = array<i64: 1, 64>}]} {
    %c0_i32 = arith.constant 0 : i32
    %0 = arith.cmpi eq, %arg0, %c0_i32 : i32
    %1 = arith.extui %0 : i1 to i32
    %c0_i32_0 = arith.constant 0 : i32
    %2 = arith.cmpi ne, %1, %c0_i32_0 : i32
    scf.if %2 {
      %cst_48 = arith.constant 0.000000e+00 : f32
      %123 = vector.broadcast %cst_48 : f32 to vector<1x64xf32>
      %c0_49 = arith.constant 0 : index
      %c0_50 = arith.constant 0 : index
      %124 = vector.load %arg7[%c0_49, %c0_50] : memref<1x64xf32, #tpu.memory_space<vmem>>, vector<1x64xf32>
      tpu.vector_store %arg7[%c0_49, %c0_50], %123 {strides = array<i32>} : memref<1x64xf32, #tpu.memory_space<vmem>>, vector<1x64xf32>,
      %cst_51 = arith.constant 0.000000e+00 : f32
      %125 = vector.broadcast %cst_51 : f32 to vector<1x64xf32>
      %c0_52 = arith.constant 0 : index
      %c0_53 = arith.constant 0 : index
      %126 = vector.load %arg8[%c0_52, %c0_53] : memref<1x64xf32, #tpu.memory_space<vmem>>, vector<1x64xf32>
      tpu.vector_store %arg8[%c0_52, %c0_53], %125 {strides = array<i32>} : memref<1x64xf32, #tpu.memory_space<vmem>>, vector<1x64xf32>,
    } else {
    }
    %cst = arith.constant 0.000000e+00 : f32
    %3 = vector.broadcast %cst : f32 to vector<1x64xf32>
    %cst_1 = arith.constant 0.000000e+00 : f32
    %4 = vector.broadcast %cst_1 : f32 to vector<1x64xf32>
    %c0 = arith.constant 0 : index
    %c0_2 = arith.constant 0 : index
    %c0_3 = arith.constant 0 : index
    %5 = vector.load %arg1[%c0, %c0_2, %c0_3] : memref<2x8x64xbf16, #tpu.memory_space<vmem>>, vector<1x8x64xbf16>
    %6 = vector.shape_cast %5 : vector<1x8x64xbf16> to vector<8x64xbf16>
    %7 = vector.extract_strided_slice %6 {offsets = [0, 32], sizes = [8, 32], strides = [1, 1]} : vector<8x64xbf16> to vector<8x32xbf16>
    %8 = tpu.concatenate %7, %6 in 1 : vector<8x32xbf16>, vector<8x64xbf16> -> vector<8x96xbf16>
    %9 = vector.extract_strided_slice %8 {offsets = [7, 0], sizes = [1, 96], strides = [1, 1]} : vector<8x96xbf16> to vector<1x96xbf16>
    %10 = tpu.concatenate %8, %9 in 0 : vector<8x96xbf16>, vector<1x96xbf16> -> vector<9x96xbf16>
    %11 = vector.extract_strided_slice %10 {offsets = [0, 48], sizes = [1, 48], strides = [1, 1]} : vector<9x96xbf16> to vector<1x48xbf16>
    %12 = vector.extract_strided_slice %10 {offsets = [0, 0], sizes = [1, 48], strides = [1, 1]} : vector<9x96xbf16> to vector<1x48xbf16>
    %13 = tpu.concatenate %11, %12 in 1 : vector<1x48xbf16>, vector<1x48xbf16> -> vector<1x96xbf16>
    %14 = tpu.concatenate %13, %10 in 0 : vector<1x96xbf16>, vector<9x96xbf16> -> vector<10x96xbf16>
    %15 = vector.extract_strided_slice %14 {offsets = [0, 0], sizes = [8, 96], strides = [1, 1]} : vector<10x96xbf16> to vector<8x96xbf16>
    %16 = vector.extract_strided_slice %14 {offsets = [1, 0], sizes = [8, 96], strides = [1, 1]} : vector<10x96xbf16> to vector<8x96xbf16>
    %17 = vector.extract_strided_slice %14 {offsets = [2, 0], sizes = [8, 96], strides = [1, 1]} : vector<10x96xbf16> to vector<8x96xbf16>
    %18 = tpu.concatenate %15, %16, %17 in 1 : vector<8x96xbf16>, vector<8x96xbf16>, vector<8x96xbf16> -> vector<8x288xbf16>
    %c0_4 = arith.constant 0 : index
    %c0_5 = arith.constant 0 : index
    %19 = vector.load %arg2[%c0_4, %c0_5] : memref<288x128xbf16, #tpu.memory_space<vmem>>, vector<288x128xbf16>
    %cst_6 = arith.constant dense<0.000000e+00> : vector<8x128xf32>
    %20 = tpu.matmul %18, %19, %cst_6 {dimension_numbers = #tpu.dot_dimension_numbers<[1], [0], [0], [1], [0, 0, 1, 1], [], []>} : vector<8x288xbf16>, vector<288x128xbf16>, vector<8x128xf32> -> vector<8x128xf32>
    %c0_7 = arith.constant 0 : index
    %c0_8 = arith.constant 0 : index
    %21 = vector.load %arg3[%c0_7, %c0_8] : memref<1x128xf32, #tpu.memory_space<vmem>>, vector<1x128xf32>
    %22 = vector.broadcast %21 : vector<1x128xf32> to vector<8x128xf32>
    %23 = arith.addf %20, %22 : vector<8x128xf32>
    %24 = vector.extract_strided_slice %23 {offsets = [0, 112], sizes = [8, 16], strides = [1, 1]} : vector<8x128xf32> to vector<8x16xf32>
    %25 = tpu.concatenate %24, %23 in 1 : vector<8x16xf32>, vector<8x128xf32> -> vector<8x144xf32>
    %26 = vector.extract_strided_slice %25 {offsets = [0, 0], sizes = [6, 112], strides = [1, 1]} : vector<8x144xf32> to vector<6x112xf32>
    %27 = vector.extract_strided_slice %25 {offsets = [0, 16], sizes = [6, 112], strides = [1, 1]} : vector<8x144xf32> to vector<6x112xf32>
    %28 = arith.maximumf %26, %27 : vector<6x112xf32>
    %29 = vector.extract_strided_slice %25 {offsets = [0, 32], sizes = [6, 112], strides = [1, 1]} : vector<8x144xf32> to vector<6x112xf32>
    %30 = arith.maximumf %28, %29 : vector<6x112xf32>
    %31 = vector.extract_strided_slice %25 {offsets = [1, 0], sizes = [6, 112], strides = [1, 1]} : vector<8x144xf32> to vector<6x112xf32>
    %32 = arith.maximumf %30, %31 : vector<6x112xf32>
    %33 = vector.extract_strided_slice %25 {offsets = [1, 16], sizes = [6, 112], strides = [1, 1]} : vector<8x144xf32> to vector<6x112xf32>
    %34 = arith.maximumf %32, %33 : vector<6x112xf32>
    %35 = vector.extract_strided_slice %25 {offsets = [1, 32], sizes = [6, 112], strides = [1, 1]} : vector<8x144xf32> to vector<6x112xf32>
    %36 = arith.maximumf %34, %35 : vector<6x112xf32>
    %37 = vector.extract_strided_slice %25 {offsets = [2, 0], sizes = [6, 112], strides = [1, 1]} : vector<8x144xf32> to vector<6x112xf32>
    %38 = arith.maximumf %36, %37 : vector<6x112xf32>
    %39 = vector.extract_strided_slice %25 {offsets = [2, 16], sizes = [6, 112], strides = [1, 1]} : vector<8x144xf32> to vector<6x112xf32>
    %40 = arith.maximumf %38, %39 : vector<6x112xf32>
    %41 = vector.extract_strided_slice %25 {offsets = [2, 32], sizes = [6, 112], strides = [1, 1]} : vector<8x144xf32> to vector<6x112xf32>
    %42 = arith.maximumf %40, %41 : vector<6x112xf32>
    %c0_9 = arith.constant 0 : index
    %c0_10 = arith.constant 0 : index
    %43 = vector.load %arg4[%c0_9, %c0_10] : memref<112x64xf32, #tpu.memory_space<vmem>>, vector<112x64xf32>
    %cst_11 = arith.constant dense<0.000000e+00> : vector<6x64xf32>
    %44 = tpu.matmul %42, %43, %cst_11 {dimension_numbers = #tpu.dot_dimension_numbers<[1], [0], [0], [1], [0, 0, 1, 1], [], []>} : vector<6x112xf32>, vector<112x64xf32>, vector<6x64xf32> -> vector<6x64xf32>
    %c0_12 = arith.constant 0 : index
    %c0_13 = arith.constant 0 : index
    %45 = vector.load %arg5[%c0_12, %c0_13] : memref<3x6xf32, #tpu.memory_space<vmem>>, vector<3x6xf32>
    %cst_14 = arith.constant dense<0.000000e+00> : vector<3x64xf32>
    %46 = tpu.matmul %45, %44, %cst_14 {dimension_numbers = #tpu.dot_dimension_numbers<[1], [0], [0], [1], [0, 0, 1, 1], [], []>} : vector<3x6xf32>, vector<6x64xf32>, vector<3x64xf32> -> vector<3x64xf32>
    %cst_15 = arith.constant 0.000000e+00 : f32
    %47 = vector.broadcast %cst_15 : f32 to vector<3x64xf32>
    %48 = arith.maximumf %46, %47 : vector<3x64xf32>
    %49 = arith.truncf %48 : vector<3x64xf32> to vector<3x64xbf16>
    %c0_16 = arith.constant 0 : index
    %c0_17 = arith.constant 0 : index
    %c0_18 = arith.constant 0 : index
    %50 = vector.load %arg6[%c0_16, %c0_17, %c0_18] : memref<2x3x64xbf16, #tpu.memory_space<vmem>>, vector<1x3x64xbf16>
    %51 = vector.shape_cast %50 : vector<1x3x64xbf16> to vector<3x64xbf16>
    %52 = vector.shape_cast %49 : vector<3x64xbf16> to vector<1x3x64xbf16>
    tpu.vector_store %arg6[%c0_16, %c0_17, %c0_18], %52 {strides = array<i32>} : memref<2x3x64xbf16, #tpu.memory_space<vmem>>, vector<1x3x64xbf16>,
    %53 = arith.extf %49 : vector<3x64xbf16> to vector<3x64xf32>
    %cst_19 = arith.constant dense<0.000000e+00> : vector<64xf32>
    %54 = vector.multi_reduction <add>, %53, %cst_19 [0] : vector<3x64xf32> to vector<64xf32>
    %55 = vector.shape_cast %54 : vector<64xf32> to vector<1x64xf32>
    %56 = arith.addf %3, %55 : vector<1x64xf32>
    %57 = arith.mulf %53, %53 : vector<3x64xf32>
    %cst_20 = arith.constant dense<0.000000e+00> : vector<64xf32>
    %58 = vector.multi_reduction <add>, %57, %cst_20 [0] : vector<3x64xf32> to vector<64xf32>
    %59 = vector.shape_cast %58 : vector<64xf32> to vector<1x64xf32>
    %60 = arith.addf %4, %59 : vector<1x64xf32>
    %c1 = arith.constant 1 : index
    %c0_21 = arith.constant 0 : index
    %c0_22 = arith.constant 0 : index
    %61 = vector.load %arg1[%c1, %c0_21, %c0_22] : memref<2x8x64xbf16, #tpu.memory_space<vmem>>, vector<1x8x64xbf16>
    %62 = vector.shape_cast %61 : vector<1x8x64xbf16> to vector<8x64xbf16>
    %63 = vector.extract_strided_slice %62 {offsets = [0, 32], sizes = [8, 32], strides = [1, 1]} : vector<8x64xbf16> to vector<8x32xbf16>
    %64 = tpu.concatenate %63, %62 in 1 : vector<8x32xbf16>, vector<8x64xbf16> -> vector<8x96xbf16>
    %65 = vector.extract_strided_slice %64 {offsets = [7, 0], sizes = [1, 96], strides = [1, 1]} : vector<8x96xbf16> to vector<1x96xbf16>
    %66 = tpu.concatenate %64, %65 in 0 : vector<8x96xbf16>, vector<1x96xbf16> -> vector<9x96xbf16>
    %67 = vector.extract_strided_slice %66 {offsets = [0, 48], sizes = [1, 48], strides = [1, 1]} : vector<9x96xbf16> to vector<1x48xbf16>
    %68 = vector.extract_strided_slice %66 {offsets = [0, 0], sizes = [1, 48], strides = [1, 1]} : vector<9x96xbf16> to vector<1x48xbf16>
    %69 = tpu.concatenate %67, %68 in 1 : vector<1x48xbf16>, vector<1x48xbf16> -> vector<1x96xbf16>
    %70 = tpu.concatenate %69, %66 in 0 : vector<1x96xbf16>, vector<9x96xbf16> -> vector<10x96xbf16>
    %71 = vector.extract_strided_slice %70 {offsets = [0, 0], sizes = [8, 96], strides = [1, 1]} : vector<10x96xbf16> to vector<8x96xbf16>
    %72 = vector.extract_strided_slice %70 {offsets = [1, 0], sizes = [8, 96], strides = [1, 1]} : vector<10x96xbf16> to vector<8x96xbf16>
    %73 = vector.extract_strided_slice %70 {offsets = [2, 0], sizes = [8, 96], strides = [1, 1]} : vector<10x96xbf16> to vector<8x96xbf16>
    %74 = tpu.concatenate %71, %72, %73 in 1 : vector<8x96xbf16>, vector<8x96xbf16>, vector<8x96xbf16> -> vector<8x288xbf16>
    %c0_23 = arith.constant 0 : index
    %c0_24 = arith.constant 0 : index
    %75 = vector.load %arg2[%c0_23, %c0_24] : memref<288x128xbf16, #tpu.memory_space<vmem>>, vector<288x128xbf16>
    %cst_25 = arith.constant dense<0.000000e+00> : vector<8x128xf32>
    %76 = tpu.matmul %74, %75, %cst_25 {dimension_numbers = #tpu.dot_dimension_numbers<[1], [0], [0], [1], [0, 0, 1, 1], [], []>} : vector<8x288xbf16>, vector<288x128xbf16>, vector<8x128xf32> -> vector<8x128xf32>
    %c0_26 = arith.constant 0 : index
    %c0_27 = arith.constant 0 : index
    %77 = vector.load %arg3[%c0_26, %c0_27] : memref<1x128xf32, #tpu.memory_space<vmem>>, vector<1x128xf32>
    %78 = vector.broadcast %77 : vector<1x128xf32> to vector<8x128xf32>
    %79 = arith.addf %76, %78 : vector<8x128xf32>
    %80 = vector.extract_strided_slice %79 {offsets = [0, 112], sizes = [8, 16], strides = [1, 1]} : vector<8x128xf32> to vector<8x16xf32>
    %81 = tpu.concatenate %80, %79 in 1 : vector<8x16xf32>, vector<8x128xf32> -> vector<8x144xf32>
    %82 = vector.extract_strided_slice %81 {offsets = [0, 0], sizes = [6, 112], strides = [1, 1]} : vector<8x144xf32> to vector<6x112xf32>
    %83 = vector.extract_strided_slice %81 {offsets = [0, 16], sizes = [6, 112], strides = [1, 1]} : vector<8x144xf32> to vector<6x112xf32>
    %84 = arith.maximumf %82, %83 : vector<6x112xf32>
    %85 = vector.extract_strided_slice %81 {offsets = [0, 32], sizes = [6, 112], strides = [1, 1]} : vector<8x144xf32> to vector<6x112xf32>
    %86 = arith.maximumf %84, %85 : vector<6x112xf32>
    %87 = vector.extract_strided_slice %81 {offsets = [1, 0], sizes = [6, 112], strides = [1, 1]} : vector<8x144xf32> to vector<6x112xf32>
    %88 = arith.maximumf %86, %87 : vector<6x112xf32>
    %89 = vector.extract_strided_slice %81 {offsets = [1, 16], sizes = [6, 112], strides = [1, 1]} : vector<8x144xf32> to vector<6x112xf32>
    %90 = arith.maximumf %88, %89 : vector<6x112xf32>
    %91 = vector.extract_strided_slice %81 {offsets = [1, 32], sizes = [6, 112], strides = [1, 1]} : vector<8x144xf32> to vector<6x112xf32>
    %92 = arith.maximumf %90, %91 : vector<6x112xf32>
    %93 = vector.extract_strided_slice %81 {offsets = [2, 0], sizes = [6, 112], strides = [1, 1]} : vector<8x144xf32> to vector<6x112xf32>
    %94 = arith.maximumf %92, %93 : vector<6x112xf32>
    %95 = vector.extract_strided_slice %81 {offsets = [2, 16], sizes = [6, 112], strides = [1, 1]} : vector<8x144xf32> to vector<6x112xf32>
    %96 = arith.maximumf %94, %95 : vector<6x112xf32>
    %97 = vector.extract_strided_slice %81 {offsets = [2, 32], sizes = [6, 112], strides = [1, 1]} : vector<8x144xf32> to vector<6x112xf32>
    %98 = arith.maximumf %96, %97 : vector<6x112xf32>
    %c0_28 = arith.constant 0 : index
    %c0_29 = arith.constant 0 : index
    %99 = vector.load %arg4[%c0_28, %c0_29] : memref<112x64xf32, #tpu.memory_space<vmem>>, vector<112x64xf32>
    %cst_30 = arith.constant dense<0.000000e+00> : vector<6x64xf32>
    %100 = tpu.matmul %98, %99, %cst_30 {dimension_numbers = #tpu.dot_dimension_numbers<[1], [0], [0], [1], [0, 0, 1, 1], [], []>} : vector<6x112xf32>, vector<112x64xf32>, vector<6x64xf32> -> vector<6x64xf32>
    %c0_31 = arith.constant 0 : index
    %c0_32 = arith.constant 0 : index
    %101 = vector.load %arg5[%c0_31, %c0_32] : memref<3x6xf32, #tpu.memory_space<vmem>>, vector<3x6xf32>
    %cst_33 = arith.constant dense<0.000000e+00> : vector<3x64xf32>
    %102 = tpu.matmul %101, %100, %cst_33 {dimension_numbers = #tpu.dot_dimension_numbers<[1], [0], [0], [1], [0, 0, 1, 1], [], []>} : vector<3x6xf32>, vector<6x64xf32>, vector<3x64xf32> -> vector<3x64xf32>
    %cst_34 = arith.constant 0.000000e+00 : f32
    %103 = vector.broadcast %cst_34 : f32 to vector<3x64xf32>
    %104 = arith.maximumf %102, %103 : vector<3x64xf32>
    %105 = arith.truncf %104 : vector<3x64xf32> to vector<3x64xbf16>
    %c1_35 = arith.constant 1 : index
    %c0_36 = arith.constant 0 : index
    %c0_37 = arith.constant 0 : index
    %106 = vector.load %arg6[%c1_35, %c0_36, %c0_37] : memref<2x3x64xbf16, #tpu.memory_space<vmem>>, vector<1x3x64xbf16>
    %107 = vector.shape_cast %106 : vector<1x3x64xbf16> to vector<3x64xbf16>
    %108 = vector.shape_cast %105 : vector<3x64xbf16> to vector<1x3x64xbf16>
    tpu.vector_store %arg6[%c1_35, %c0_36, %c0_37], %108 {strides = array<i32>} : memref<2x3x64xbf16, #tpu.memory_space<vmem>>, vector<1x3x64xbf16>,
    %109 = arith.extf %105 : vector<3x64xbf16> to vector<3x64xf32>
    %cst_38 = arith.constant dense<0.000000e+00> : vector<64xf32>
    %110 = vector.multi_reduction <add>, %109, %cst_38 [0] : vector<3x64xf32> to vector<64xf32>
    %111 = vector.shape_cast %110 : vector<64xf32> to vector<1x64xf32>
    %112 = arith.addf %56, %111 : vector<1x64xf32>
    %113 = arith.mulf %109, %109 : vector<3x64xf32>
    %cst_39 = arith.constant dense<0.000000e+00> : vector<64xf32>
    %114 = vector.multi_reduction <add>, %113, %cst_39 [0] : vector<3x64xf32> to vector<64xf32>
    %115 = vector.shape_cast %114 : vector<64xf32> to vector<1x64xf32>
    %116 = arith.addf %60, %115 : vector<1x64xf32>
    %c0_40 = arith.constant 0 : index
    %c0_41 = arith.constant 0 : index
    %117 = vector.load %arg7[%c0_40, %c0_41] : memref<1x64xf32, #tpu.memory_space<vmem>>, vector<1x64xf32>
    %118 = arith.addf %117, %112 : vector<1x64xf32>
    %c0_42 = arith.constant 0 : index
    %c0_43 = arith.constant 0 : index
    %119 = vector.load %arg7[%c0_42, %c0_43] : memref<1x64xf32, #tpu.memory_space<vmem>>, vector<1x64xf32>
    tpu.vector_store %arg7[%c0_42, %c0_43], %118 {strides = array<i32>} : memref<1x64xf32, #tpu.memory_space<vmem>>, vector<1x64xf32>,
    %c0_44 = arith.constant 0 : index
    %c0_45 = arith.constant 0 : index
    %120 = vector.load %arg8[%c0_44, %c0_45] : memref<1x64xf32, #tpu.memory_space<vmem>>, vector<1x64xf32>
    %121 = arith.addf %120, %116 : vector<1x64xf32>
    %c0_46 = arith.constant 0 : index
    %c0_47 = arith.constant 0 : index
    %122 = vector.load %arg8[%c0_46, %c0_47] : memref<1x64xf32, #tpu.memory_space<vmem>>, vector<1x64xf32>
    tpu.vector_store %arg8[%c0_46, %c0_47], %121 {strides = array<i32>} : memref<1x64xf32, #tpu.memory_space<vmem>>, vector<1x64xf32>,
    return
  }
  func.func @transform_0(%arg0: i32) -> (i32, i32, i32) {
    %c0_i32 = arith.constant 0 : i32
    %c0_i32_0 = arith.constant 0 : i32
    %c0_i32_1 = arith.constant 0 : i32
    return %arg0, %c0_i32, %c0_i32_0 : i32, i32, i32
  }
  func.func @transform_1(%arg0: i32) -> (i32, i32) {
    %c0_i32 = arith.constant 0 : i32
    %c0_i32_0 = arith.constant 0 : i32
    %c0_i32_1 = arith.constant 0 : i32
    return %c0_i32, %c0_i32_0 : i32, i32
  }
  func.func @transform_2(%arg0: i32) -> (i32, i32) {
    %c0_i32 = arith.constant 0 : i32
    %c0_i32_0 = arith.constant 0 : i32
    %c0_i32_1 = arith.constant 0 : i32
    return %c0_i32, %c0_i32_0 : i32, i32
  }
  func.func @transform_3(%arg0: i32) -> (i32, i32) {
    %c0_i32 = arith.constant 0 : i32
    %c0_i32_0 = arith.constant 0 : i32
    %c0_i32_1 = arith.constant 0 : i32
    return %c0_i32, %c0_i32_0 : i32, i32
  }
  func.func @transform_4(%arg0: i32) -> (i32, i32) {
    %c0_i32 = arith.constant 0 : i32
    %c0_i32_0 = arith.constant 0 : i32
    %c0_i32_1 = arith.constant 0 : i32
    return %c0_i32, %c0_i32_0 : i32, i32
  }
  func.func @transform_5(%arg0: i32) -> (i32, i32, i32) {
    %c0_i32 = arith.constant 0 : i32
    %c0_i32_0 = arith.constant 0 : i32
    %c0_i32_1 = arith.constant 0 : i32
    return %arg0, %c0_i32, %c0_i32_0 : i32, i32, i32
  }
  func.func @transform_6(%arg0: i32) -> (i32, i32) {
    %c0_i32 = arith.constant 0 : i32
    %c0_i32_0 = arith.constant 0 : i32
    %c0_i32_1 = arith.constant 0 : i32
    return %c0_i32, %c0_i32_0 : i32, i32
  }
  func.func @transform_7(%arg0: i32) -> (i32, i32) {
    %c0_i32 = arith.constant 0 : i32
    %c0_i32_0 = arith.constant 0 : i32
    %c0_i32_1 = arith.constant 0 : i32
    return %c0_i32, %c0_i32_0 : i32, i32
  }
}

module attributes {stable_mosaic.version = 11 : i64} {
  func.func @_bn_apply_kernel(%arg0: i32, %arg1: memref<1x3x64xbf16, #tpu.memory_space<vmem>>, %arg2: memref<1x64xf32, #tpu.memory_space<vmem>>, %arg3: memref<1x64xf32, #tpu.memory_space<vmem>>, %arg4: memref<1x3x64xbf16, #tpu.memory_space<vmem>>) attributes {dimension_semantics = [#tpu.dimension_semantics<parallel>], iteration_bounds = array<i64: 2>, scalar_prefetch = 0 : i64, scratch_operands = 0 : i64, tpu.core_type = #tpu.core_type<tc>, window_params = [{transform_indices = @transform_0, window_bounds = array<i64: 1, 3, 64>}, {pipeline_mode = #tpu.pipeline_mode<synchronous>, transform_indices = @transform_1, window_bounds = array<i64: 1, 64>}, {pipeline_mode = #tpu.pipeline_mode<synchronous>, transform_indices = @transform_2, window_bounds = array<i64: 1, 64>}, {transform_indices = @transform_3, window_bounds = array<i64: 1, 3, 64>}]} {
    %c0 = arith.constant 0 : index
    %c0_0 = arith.constant 0 : index
    %c0_1 = arith.constant 0 : index
    %0 = vector.load %arg1[%c0, %c0_0, %c0_1] : memref<1x3x64xbf16, #tpu.memory_space<vmem>>, vector<1x3x64xbf16>
    %1 = arith.extf %0 : vector<1x3x64xbf16> to vector<1x3x64xf32>
    %c0_2 = arith.constant 0 : index
    %c0_3 = arith.constant 0 : index
    %2 = vector.load %arg2[%c0_2, %c0_3] : memref<1x64xf32, #tpu.memory_space<vmem>>, vector<1x64xf32>
    %3 = vector.shape_cast %2 : vector<1x64xf32> to vector<1x1x64xf32>
    %4 = vector.broadcast %3 : vector<1x1x64xf32> to vector<1x3x64xf32>
    %5 = arith.mulf %1, %4 : vector<1x3x64xf32>
    %c0_4 = arith.constant 0 : index
    %c0_5 = arith.constant 0 : index
    %6 = vector.load %arg3[%c0_4, %c0_5] : memref<1x64xf32, #tpu.memory_space<vmem>>, vector<1x64xf32>
    %7 = vector.shape_cast %6 : vector<1x64xf32> to vector<1x1x64xf32>
    %8 = vector.broadcast %7 : vector<1x1x64xf32> to vector<1x3x64xf32>
    %9 = arith.addf %5, %8 : vector<1x3x64xf32>
    %10 = arith.truncf %9 : vector<1x3x64xf32> to vector<1x3x64xbf16>
    %c0_6 = arith.constant 0 : index
    %c0_7 = arith.constant 0 : index
    %c0_8 = arith.constant 0 : index
    %11 = vector.load %arg4[%c0_6, %c0_7, %c0_8] : memref<1x3x64xbf16, #tpu.memory_space<vmem>>, vector<1x3x64xbf16>
    tpu.vector_store %arg4[%c0_6, %c0_7, %c0_8], %10 {strides = array<i32>} : memref<1x3x64xbf16, #tpu.memory_space<vmem>>, vector<1x3x64xbf16>,
    return
  }
  func.func @transform_0(%arg0: i32) -> (i32, i32, i32) {
    %c0_i32 = arith.constant 0 : i32
    %c0_i32_0 = arith.constant 0 : i32
    %c0_i32_1 = arith.constant 0 : i32
    return %arg0, %c0_i32, %c0_i32_0 : i32, i32, i32
  }
  func.func @transform_1(%arg0: i32) -> (i32, i32) {
    %c0_i32 = arith.constant 0 : i32
    %c0_i32_0 = arith.constant 0 : i32
    %c0_i32_1 = arith.constant 0 : i32
    return %c0_i32, %c0_i32_0 : i32, i32
  }
  func.func @transform_2(%arg0: i32) -> (i32, i32) {
    %c0_i32 = arith.constant 0 : i32
    %c0_i32_0 = arith.constant 0 : i32
    %c0_i32_1 = arith.constant 0 : i32
    return %c0_i32, %c0_i32_0 : i32, i32
  }
  func.func @transform_3(%arg0: i32) -> (i32, i32, i32) {
    %c0_i32 = arith.constant 0 : i32
    %c0_i32_0 = arith.constant 0 : i32
    %c0_i32_1 = arith.constant 0 : i32
    return %arg0, %c0_i32, %c0_i32_0 : i32, i32, i32
  }
}

</mosaic_0001>

<bundles_post_ra>
// kernel: tile.33
= control target key start
LH: loop header
LB: loop body
LE: loop exit
PB: predicated region body
PF: predicated region fallthrough
CT: control target
= control target key end

     0   :  { %s28_s0 = inlined_call_operand.vmem [shape: f32[8], index: 0, kind: input, shape index: {}]   ;;  %s29_s1 = inlined_call_operand.vmem [shape: f32[16,8], index: 1, kind: output, shape index: {}]  }
   0x1   :  { %v4_v0 = vld [vmem:[%s28_s0] ss:$0 sm:$0xff] }
   0x2   :  { %5 = vst [vmem:[%s29_s1] sm:$0xff] %v4_v0  ;;  %8 = vst [vmem:[%s29_s1 + $0x8] sm:$0xff] %v4_v0 }

// kernel: tile.34
= control target key start
LH: loop header
LB: loop body
LE: loop exit
PB: predicated region body
PF: predicated region fallthrough
CT: control target
= control target key end

     0   :  { %s131_s10 = smov 120   ;;  %s132_s11 = smov 104   ;;  %vm3_vm0 = vcmask 64512   ;;  %vm9_vm1 = vcmask 1048512   ;;  %vm15_vm2 = vcmask 982912   ;;  %vm21_vm3 = vcmask 917312   ;;  %s207_s0 = inlined_call_operand.vmem [shape: f32[16,8], index: 0, kind: input, shape index: {}]   ;;  %s208_s1 = inlined_call_operand.vmem [shape: f32[1,128], index: 1, kind: output, shape index: {}]  }
   0x1   :  { %v101_v0 = vld [vmem:[%s207_s0 + $0xf] sm:$0x1]   ;;  %v103_v1 = vld [vmem:[%s207_s0 + $0xd] sm:$0x1]   ;;  %v102_v2 = vld [vmem:[%s207_s0 + $0xe] sm:$0x1]  }
   0x2   :  { %7 = vrot.lane.b32.xlu0 %v101_v0, %s131_s10  ;;  %19 = vrot.lane.b32.xlu1 %v103_v1, %s132_s11  ;;  %v104_v3 = vld [vmem:[%s207_s0 + $0xc] sm:$0x1]   ;;  %s133_s16 = smov 112   ;;  %s134_s17 = smov 96   ;;  %v105_v4 = vld [vmem:[%s207_s0 + $0xb] sm:$0x1]  }
   0x3   :  { %v106_v5 = vld [vmem:[%s207_s0 + $0xa] sm:$0x1]   ;;  %v2_v6 = vld [vmem:[%s207_s0] sm:$0x1]   ;;  %s135_s24 = smov 88   ;;  %s136_s25 = smov 80  }
   0x4   :  { %4 = vst.msk [vmem:[#allocation0] sm:$0x1] %vm3_vm0, %v2_v6   ;;  %v107_v7 = vld [vmem:[%s207_s0 + $0x9] sm:$0x1]   ;;  %v108_v8 = vld [vmem:[%s207_s0 + $0x8] sm:$0x1]  }
   0x5   :  { %s137_s30 = smov 72   ;;  %s138_s2 = smov 64   ;;  %v109_v9 = vld [vmem:[%s207_s0 + $0x7] sm:$0x1]   ;;  %v110_v10 = vld [vmem:[%s207_s0 + $0x6] sm:$0x1]  }
   0x6   :  { %13 = vrot.lane.b32.xlu0 %v102_v2, %s133_s16  ;;  %25 = vrot.lane.b32.xlu1 %v104_v3, %s134_s17  ;;  %s139_s7 = smov 56   ;;  %s140_s8 = smov 48   ;;  %v111_v11 = vld [vmem:[%s207_s0 + $0x5] sm:$0x1]   ;;  %v112_v12 = vld [vmem:[%s207_s0 + $0x4] sm:$0x1]  }
   0x7   :  { %s141_s13 = smov 40   ;;  %s142_s14 = smov 32   ;;  %v113_v13 = vld [vmem:[%s207_s0 + $0x3] sm:$0x1]   ;;  %v114_v14 = vld [vmem:[%s207_s0 + $0x2] sm:$0x1]  }
   0x8   :  { %s143_s19 = smov 24   ;;  %s144_s20 = smov 16   ;;  %v115_v15 = vld [vmem:[%s207_s0 + $0x1] sm:$0x1]   ;;  %vm27_vm4 = vcmask 851712   ;;  %vm33_vm5 = vcmask 786112  }
   0x9   :  { %s145_s0 = smov 8   ;;  %vm39_vm6 = vcmask 720512   ;;  %vm45_vm7 = vcmask 654912   ;;  %vm51_vm8 = vcmask 589312   ;;  %vm57_vm9 = vcmask 523712  }
   0xa   :  { %31 = vrot.lane.b32.xlu0 %v105_v4, %s135_s24  ;;  %37 = vrot.lane.b32.xlu1 %v106_v5, %s136_s25  ;;  %vm63_vm10 = vcmask 458112   ;;  %vm69_vm11 = vcmask 392512   ;;  %vm75_vm12 = vcmask 326912   ;;  %vm81_vm13 = vcmask 261312  }
   0xb   :  { %vm87_vm14 = vcmask 195712   ;;  %vm93_vm15 = vcmask 130112  }
   0xe   :  { %43 = vrot.lane.b32.xlu0 %v107_v7, %s137_s30  ;;  %49 = vrot.lane.b32.xlu1 %v108_v8, %s138_s2 }
  0x12   :  { %55 = vrot.lane.b32.xlu0 %v109_v9, %s139_s7  ;;  %61 = vrot.lane.b32.xlu1 %v110_v10, %s140_s8 }
  0x16   :  { %67 = vrot.lane.b32.xlu0 %v111_v11, %s141_s13  ;;  %73 = vrot.lane.b32.xlu1 %v112_v12, %s142_s14 }
  0x1a   :  { %79 = vrot.lane.b32.xlu0 %v113_v13, %s143_s19  ;;  %85 = vrot.lane.b32.xlu1 %v114_v14, %s144_s20 }
  0x1e   :  { %91 = vrot.lane.b32.xlu0 %v115_v15, %s145_s0 }
  0x74   :  { %v8_v16 = vpop.permute.xlu0 %7   ;;  %v20_v17 = vpop.permute.xlu1 %19  }
  0x75   :  { %10 = vst.msk [vmem:[#allocation0] sm:$0x1] %vm9_vm1, %v8_v16  }
  0x78   :  { %v14_v18 = vpop.permute.xlu0 %13   ;;  %v26_v19 = vpop.permute.xlu1 %25  }
  0x79   :  { %16 = vst.msk [vmem:[#allocation0] sm:$0x1] %vm15_vm2, %v14_v18  }
  0x7a   :  { %22 = vst.msk [vmem:[#allocation0] sm:$0x1] %vm21_vm3, %v20_v17  }
  0x7b   :  { %28 = vst.msk [vmem:[#allocation0] sm:$0x1] %vm27_vm4, %v26_v19  }
  0x7c   :  { %v32_v20 = vpop.permute.xlu0 %31   ;;  %v38_v21 = vpop.permute.xlu1 %37  }
  0x7d   :  { %34 = vst.msk [vmem:[#allocation0] sm:$0x1] %vm33_vm5, %v32_v20  }
  0x7e   :  { %40 = vst.msk [vmem:[#allocation0] sm:$0x1] %vm39_vm6, %v38_v21  }
  0x80   :  { %v44_v22 = vpop.permute.xlu0 %43   ;;  %v50_v23 = vpop.permute.xlu1 %49  }
  0x81   :  { %46 = vst.msk [vmem:[#allocation0] sm:$0x1] %vm45_vm7, %v44_v22  }
  0x82   :  { %52 = vst.msk [vmem:[#allocation0] sm:$0x1] %vm51_vm8, %v50_v23  }
  0x84   :  { %v56_v24 = vpop.permute.xlu0 %55   ;;  %v62_v25 = vpop.permute.xlu1 %61  }
  0x85   :  { %58 = vst.msk [vmem:[#allocation0] sm:$0x1] %vm57_vm9, %v56_v24  }
  0x86   :  { %64 = vst.msk [vmem:[#allocation0] sm:$0x1] %vm63_vm10, %v62_v25  }
  0x88   :  { %v68_v26 = vpop.permute.xlu0 %67   ;;  %v74_v27 = vpop.permute.xlu1 %73  }
  0x89   :  { %70 = vst.msk [vmem:[#allocation0] sm:$0x1] %vm69_vm11, %v68_v26  }
  0x8a   :  { %76 = vst.msk [vmem:[#allocation0] sm:$0x1] %vm75_vm12, %v74_v27  }
  0x8c   :  { %v80_v28 = vpop.permute.xlu0 %79   ;;  %v86_v29 = vpop.permute.xlu1 %85  }
  0x8d   :  { %82 = vst.msk [vmem:[#allocation0] sm:$0x1] %vm81_vm13, %v80_v28  }
  0x8e   :  { %88 = vst.msk [vmem:[#allocation0] sm:$0x1] %vm87_vm14, %v86_v29  }
  0x90   :  { %v92_v30 = vpop.permute.xlu0 %91  }
  0x91   :  { %94 = vst.msk [vmem:[#allocation0] sm:$0x1] %vm93_vm15, %v92_v30  }
  0x98   :  { %v98_v31 = vld [vmem:[#allocation0] sm:$0x1] }
  0x99   :  { %100 = vst [vmem:[%s208_s1] sm:$0x1] %v98_v31 }

// kernel: cnn_in_polar_coords.4
= control target key start
LH: loop header
LB: loop body
LE: loop exit
PB: predicated region body
PF: predicated region fallthrough
CT: control target
= control target key end

     0   :  { %s1218_s26 = smov 72   ;;  %s1219_s27 = smov 8   ;;  %vm42_vm0 = vcmask 64512   ;;  %v1221_v4 = vmov 0   ;;  %vm218_vm1 = vcmask 1043456   ;;  %vm68_vm2 = vcmask 1040384   ;;  %s1558_s0 = inlined_call_operand.vmem [shape: bf16[2,16,64], index: 0, kind: input, shape index: {}]   ;;  %s1559_s1 = inlined_call_operand.vmem [shape: bf16[216,128], index: 1, kind: input, shape index: {}]   ;;  %s1560_s3 = inlined_call_operand.vmem [shape: f32[120,64], index: 3, kind: input, shape index: {}]   ;;  %s1561_s2 = inlined_call_operand.vmem [shape: f32[1,128], index: 2, kind: input, shape index: {}]   ;;  %s1562_s6 = inlined_call_operand.vmem [shape: f32[1,64], index: 6, kind: output, shape index: {1}]   ;;  %s1563_s7 = inlined_call_operand.vmem [shape: f32[1,64], index: 7, kind: output, shape index: {2}]   ;;  %s1564_s4 = inlined_call_operand.vmem [shape: f32[8,15], index: 4, kind: input, shape index: {}]   ;;  %s1565_s5 = inlined_call_operand.vmem [shape: bf16[2,8,64], index: 5, kind: output, shape index: {0}]  }
   0x1   :  { %v1188_v0 = vld [vmem:[%s1558_s0] sm:$0xff]   ;;  %s1220_s28 = smov 92   ;;  %222 = vmatprep.subr.bf16.mxu0 %v1221_v4  ;;  %v1190_v6 = vld [vmem:[%s1559_s1 + $0x8] sm:$0xff]   ;;  %s1222_s10 = smov 36   ;;  %v1191_v7 = vld [vmem:[%s1559_s1 + $0x10] sm:$0xff]   ;;  %vm54_vm4 = vcmask 293888  }
   0x2   :  { %38 = vrot.lane.b32.xlu0 %v1188_v0, %s1218_s26  ;;  %v1189_v5 = vld [vmem:[%s1559_s1] sm:$0xff]   ;;  %v1192_v8 = vld [vmem:[%s1559_s1 + $0x18] sm:$0xff]   ;;  %v1194_v10 = vld [vmem:[%s1559_s1 + $0x28] sm:$0xff]   ;;  %vm59_vm3 = vsmask.f32 256  ;;  %vm87_vm6 = vcmask 1046528  }
   0x3   :  { %223 = vmatpush1.bf16.msra.mxu0 %v1189_v5  ;;  %v1193_v9 = vld [vmem:[%s1559_s1 + $0x20] sm:$0xff]   ;;  %v1195_v11 = vld [vmem:[%s1559_s1 + $0x30] sm:$0xff]   ;;  %v1196_v12 = vld [vmem:[%s1559_s1 + $0x38] sm:$0xff]   ;;  %s1223_s16 = smov 16   ;;  %vm71_vm7 = vsmask.f32 7424 }
   0x4   :  { %224 = vmatprep.subr.bf16.mxu0 %v1221_v4  ;;  %v1197_v13 = vld [vmem:[%s1559_s1 + $0x40] sm:$0xff]   ;;  %v1198_v14 = vld [vmem:[%s1559_s1 + $0x48] sm:$0xff]   ;;  %v1199_v15 = vld [vmem:[%s1559_s1 + $0x50] sm:$0xff]   ;;  %vm97_vm8 = vcmask 130048   ;;  %vm93_vm9 = vcmask 588800   ;;  %vm215_vm10 = vcmask 719872  }
   0x5   :  { %v1200_v16 = vld [vmem:[%s1559_s1 + $0x58] sm:$0xff]   ;;  %v1201_v17 = vld [vmem:[%s1559_s1 + $0x60] sm:$0xff]   ;;  %v1202_v20 = vld [vmem:[%s1559_s1 + $0x68] ss:$0 sps:$4 sm:$0xff]   ;;  %s1224_s12 = smov 120   ;;  %vm304_vm11 = vcmask 982016  }
   0x6   :  { %40 = vrot.lane.b32.xlu0 %v1188_v0, %s1219_s27  ;;  %v220_v21 = vsel %vm218_vm1, %v1202_v20, 0  ;;  %vm1335_vm5 = vmand %vm68_vm2, %vm59_vm3  ;;  %v289_v45 = vld [vmem:[%s1560_s3] sm:$0xff]  ;;  %v290_v46 = vld [vmem:[%s1560_s3 + $0x8] sm:$0xff]  ;;  %vm28_vm12 = vcmask 516096   ;;  %vm1227_vm13 = vmmov 0   ;;  %vm1228_vm14 = vmmov 1  }
   0x7   :  { %225 = vmatpush1.bf16.msra.mxu0 %v1190_v6  ;;  %v291_v47 = vld [vmem:[%s1560_s3 + $0x10] sm:$0xff]  ;;  %v1113_v48 = vpack.c.bf16 %v290_v46, %v289_v45  ;;  %v292_v49 = vld [vmem:[%s1560_s3 + $0x18] sm:$0xff]  ;;  %v293_v51 = vld [vmem:[%s1560_s3 + $0x20] sm:$0xff]  ;;  %vm466_vm2 = vcmask 519168  }
   0x8   :  { %226 = vmatprep.subr.bf16.mxu0 %v1221_v4  ;;  %v1117_v50 = vpack.c.bf16 %v292_v49, %v291_v47  ;;  %v294_v52 = vld [vmem:[%s1560_s3 + $0x28] sm:$0xff]  ;;  %v295_v54 = vld [vmem:[%s1560_s3 + $0x30] sm:$0xff]  ;;  %v296_v55 = vld [vmem:[%s1560_s3 + $0x38] sm:$0xff] }
   0x9   :  { %1114 = vmatprep.subr.bf16.mxu1 %v1113_v48  ;;  %v1121_v53 = vpack.c.bf16 %v294_v52, %v293_v51  ;;  %v1125_v56 = vpack.c.bf16 %v296_v55, %v295_v54  ;;  %v297_v57 = vld [vmem:[%s1560_s3 + $0x40] sm:$0xff]  ;;  %v298_v58 = vld [vmem:[%s1560_s3 + $0x48] sm:$0xff]  ;;  %v299_v60 = vld [vmem:[%s1560_s3 + $0x50] sm:$0xff] }
   0xa   :  { %1116 = vmatpush3.bf16.msra.mxu1 %v1113_v48  ;;  %v1129_v59 = vpack.c.bf16 %v298_v58, %v297_v57  ;;  %v300_v61 = vld [vmem:[%s1560_s3 + $0x58] sm:$0xff]  ;;  %v301_v63 = vld [vmem:[%s1560_s3 + $0x60] sm:$0xff]  ;;  %v302_v0 = vld [vmem:[%s1560_s3 + $0x68] sm:$0xff] }
   0xb   :  { %227 = vmatpush1.bf16.msra.mxu0 %v1191_v7  ;;  %1118 = vmatprep.subr.bf16.mxu1 %v1117_v50  ;;  %v1133_v62 = vpack.c.bf16 %v300_v61, %v299_v60  ;;  %vm1443_vm15 = vmpackc.low %vm87_vm6, %vm1228_vm14  ;;  %v1452_v54 = vld [vmem:[%s1564_s4] sm:$0xff]  ;;  %v1206_v57 = vld [vmem:[%s1559_s1 + $0x10] sm:$0xff]  }
   0xc   :  { %228 = vmatprep.subr.bf16.mxu0 %v1221_v4  ;;  %v1204_v55 = vld [vmem:[%s1559_s1] sm:$0xff]   ;;  %v1207_v58 = vld [vmem:[%s1559_s1 + $0x18] sm:$0xff]   ;;  %v1209_v60 = vld [vmem:[%s1559_s1 + $0x28] sm:$0xff]  }
   0xd   :  { %v1210_v61 = vld [vmem:[%s1559_s1 + $0x30] sm:$0xff]  }
   0xe   :  { %1120 = vmatpush3.bf16.msra.mxu1 %v1117_v50 }
   0xf   :  { %229 = vmatpush1.bf16.msra.mxu0 %v1192_v8  ;;  %1122 = vmatprep.subr.bf16.mxu1 %v1121_v53 }
  0x10   :  { %230 = vmatprep.subr.bf16.mxu0 %v1221_v4 }
  0x12   :  { %1124 = vmatpush3.bf16.msra.mxu1 %v1121_v53 }
  0x13   :  { %231 = vmatpush1.bf16.msra.mxu0 %v1193_v9  ;;  %1126 = vmatprep.subr.bf16.mxu1 %v1125_v56 }
  0x14   :  { %232 = vmatprep.subr.bf16.mxu0 %v1221_v4 }
  0x16   :  { %1128 = vmatpush3.bf16.msra.mxu1 %v1125_v56 }
  0x17   :  { %233 = vmatpush1.bf16.msra.mxu0 %v1194_v10  ;;  %1130 = vmatprep.subr.bf16.mxu1 %v1129_v59 }
  0x18   :  { %234 = vmatprep.subr.bf16.mxu0 %v1221_v4 }
  0x1a   :  { %1132 = vmatpush3.bf16.msra.mxu1 %v1129_v59 }
  0x1b   :  { %235 = vmatpush1.bf16.msra.mxu0 %v1195_v11  ;;  %1134 = vmatprep.subr.bf16.mxu1 %v1133_v62 }
  0x1c   :  { %236 = vmatprep.subr.bf16.mxu0 %v1221_v4 }
  0x1e   :  { %1136 = vmatpush3.bf16.msra.mxu1 %v1133_v62 }
  0x1f   :  { %237 = vmatpush1.bf16.msra.mxu0 %v1196_v12 }
  0x20   :  { %238 = vmatprep.subr.bf16.mxu0 %v1221_v4 }
  0x23   :  { %239 = vmatpush1.bf16.msra.mxu0 %v1197_v13 }
  0x24   :  { %240 = vmatprep.subr.bf16.mxu0 %v1221_v4 }
  0x27   :  { %241 = vmatpush1.bf16.msra.mxu0 %v1198_v14  ;;  %v1203_v14 = vld [vmem:[%s1558_s0 + $0x8] sm:$0xff]  }
  0x28   :  { %242 = vmatprep.subr.bf16.mxu0 %v1221_v4 }
  0x2b   :  { %243 = vmatpush1.bf16.msra.mxu0 %v1199_v15 }
  0x2c   :  { %244 = vmatprep.subr.bf16.mxu0 %v1221_v4 }
  0x2f   :  { %245 = vmatpush1.bf16.msra.mxu0 %v1200_v16 }
  0x30   :  { %246 = vmatprep.subr.bf16.mxu0 %v1221_v4 }
  0x33   :  { %247 = vmatpush1.bf16.msra.mxu0 %v1201_v17 }
  0x34   :  { %248 = vmatprep.subr.bf16.mxu0 %v1221_v4 }
  0x37   :  { %249 = vmatpush1.bf16.msra.mxu0 %v220_v21 }
  0x38   :  { %1146 = vmatprep.subr.bf16.mxu0 %v1113_v48 }
  0x74   :  { %v39_v1 = vpop.permute.xlu0 %38 }
  0x78   :  { %v41_v2 = vpop.permute.xlu0 %40 }
  0x79   :  { %v45_v3 = vsel %vm42_vm0, %v39_v1, %v41_v2  ;;  %v1137_v1 = vpack.c.bf16 %v302_v0, %v301_v63  ;;  %v303_v2 = vld [vmem:[%s1560_s3 + $0x70] sm:$0xff] }
  0x7a   :  { %50 = vrot.lane.b32.xlu1 %v45_v3, %s1220_s28  ;;  %v46_v18 = vshrl.u32 %v45_v3, 16  ;;  %v60_v24 = vshll.u32 %v45_v3, 16 }
  0x7b   :  { %1138 = vmatprep.subr.bf16.mxu1 %v1137_v1 }
  0x7c   :  { %v48_v19 = vrot.slane %v46_v18, 7  ;;  %1140 = vmatpush3.bf16.msra.mxu1 %v1137_v1 }
  0x7d   :  { %1061 = vmatprep.subr.mxu1 %v303_v2 }
  0x7e   :  { %52 = vrot.lane.b32.xlu1 %v45_v3, %s1222_s10  ;;  %v64_v22 = vshll.u32 %v48_v19, 16  ;;  %v62_v26 = vor.u32 %v60_v24, %v48_v19  ;;  %v1398_v3 = vld [vmem:[%s1561_s2] ss:$0 sm:$0xff] }
  0x80   :  { %v66_v28 = vsel %vm59_vm3, %v48_v19, %v64_v22  ;;  %1062 = vmatpush3.msra.mxu1 %v303_v2 }
  0x81   :  { %v89_v33 = vrot.slane %v66_v28, 1  ;;  %v80_v34 = vshll.u32 %v66_v28, 16 }
  0x83   :  { %v82_v39 = vrot.slane %v80_v34, 1 }
  0xec   :  { %v51_v23 = vpop.permute.xlu1 %50 }
  0xf0   :  { %v53_v27 = vpop.permute.xlu1 %52 }
  0xf1   :  { %v57_v29 = vsel %vm54_vm4, %v51_v23, %v53_v27 }
  0xf2   :  { %v70_v30 = vsel %vm1335_vm5, %v57_v29, %v62_v26  ;;  %v1225_v29 = vmov 0.0|0.0  }
  0xf3   :  { %v75_v31 = vshll.u32 %v70_v30, 16  ;;  %v88_v32 = vrot.slane %v70_v30, 1  ;;  %v73_v35 = vshrl.u32 %v70_v30, 16  ;;  %1141 = vmatprep.subr.bf16.mxu1 %v1225_v29 }
  0xf5   :  { %v90_v36 = vsel %vm87_vm6, %v88_v32, %v89_v33  ;;  %v77_v37 = vrot.slane %v75_v31, 1 }
  0xf6   :  { %91 = vrot.lane.b32.xlu1 %v90_v36, %s1223_s16 }
  0xf7   :  { %v78_v38 = vor.u32 %v77_v37, %v73_v35 }
  0xf9   :  { %v83_v40 = vsel %vm71_vm7, %v78_v38, %v82_v39 }
  0xfa   :  { %84 = vrot.lane.b32.xlu0 %v83_v40, %s1218_s26 }
 0x168   :  { %v92_v41 = vpop.permute.xlu1 %91 }
 0x16c   :  { %v85_v42 = vpop.permute.xlu0 %84 }
 0x16d   :  { %v99_v43 = vsel %vm97_vm8, %v85_v42, %v92_v41  ;;  %v95_v44 = vsel %vm93_vm9, %v70_v30, %v85_v42  ;;  %v1226_v30 = vmov 0.0  }
 0x16e   :  { %964 = vmatprep.mubr.msk.bf16.mxu0 %vm215_vm10, %v99_v43  ;;  %29 = vst.msk [vmem:[%s1562_s6] sm:$0x1] %vm28_vm12, %v1226_v30  ;;  %30 = vst.msk [vmem:[%s1563_s7] sm:$0x1] %vm28_vm12, %v1226_v30 }
 0x16f   :  { %255 = vmatmul.mubr.bf16.vlgmr.msra.gmra.mrb[0].mxu0 %v95_v44 }
 0x170   :  { %1148 = vmatpush3.bf16.msra.mxu0 %v1113_v48 }
 0x171   :  { %1150 = vmatprep.subr.bf16.mxu0 %v1117_v50 }
 0x174   :  { %1152 = vmatpush3.bf16.msra.mxu0 %v1117_v50 }
 0x175   :  { %1154 = vmatprep.subr.bf16.mxu0 %v1121_v53 }
 0x178   :  { %1156 = vmatpush3.bf16.msra.mxu0 %v1121_v53 }
 0x179   :  { %1158 = vmatprep.subr.bf16.mxu0 %v1125_v56 }
 0x17c   :  { %1160 = vmatpush3.bf16.msra.mxu0 %v1125_v56  ;;  %v1205_v56 = vld [vmem:[%s1559_s1 + $0x8] sm:$0xff]  }
 0x17d   :  { %1162 = vmatprep.subr.bf16.mxu0 %v1129_v59 }
 0x180   :  { %1164 = vmatpush3.bf16.msra.mxu0 %v1129_v59  ;;  %v1208_v59 = vld [vmem:[%s1559_s1 + $0x20] sm:$0xff]  }
 0x181   :  { %1166 = vmatprep.subr.bf16.mxu0 %v1133_v62 }
 0x184   :  { %1168 = vmatpush3.bf16.msra.mxu0 %v1133_v62 }
 0x185   :  { %1170 = vmatprep.subr.bf16.mxu0 %v1137_v1 }
 0x188   :  { %1172 = vmatpush3.bf16.msra.mxu0 %v1137_v1  ;;  %v1211_v1 = vld [vmem:[%s1559_s1 + $0x38] sm:$0xff]  }
 0x189   :  { %1101 = vmatprep.subr.mxu0 %v303_v2 }
 0x18c   :  { %1102 = vmatpush3.msra.mxu0 %v303_v2  ;;  %v1212_v2 = vld [vmem:[%s1559_s1 + $0x40] sm:$0xff]  }
 0x18d   :  { %1173 = vmatprep.subr.bf16.mxu0 %v1225_v29 }
 0x242   :  { %v256_v5 = vpop.f32.mrb[0].mxu0 }
 0x243   :  { %v257_v6 = vadd.f32 %v1398_v3, %v256_v5  ;;  %v258_v7 = vpop.f32.mrb[1].mxu0  ;;  %v1213_v5 = vld [vmem:[%s1559_s1 + $0x48] sm:$0xff]  }
 0x244   :  { %v259_v8 = vpop.f32.mrb[2].mxu0  ;;  %v1215_v7 = vld [vmem:[%s1559_s1 + $0x58] sm:$0xff]  }
 0x245   :  { %v260_v9 = vadd.f32 %v1398_v3, %v259_v8  ;;  %v261_v10 = vpop.f32.mrb[3].mxu0  ;;  %265 = vrot.lane.b32.xlu0 %v257_v6, %s1224_s12  ;;  %v274_v11 = vrot.slane %v257_v6, 1  ;;  %v1216_v8 = vld [vmem:[%s1559_s1 + $0x60] sm:$0xff]  }
 0x247   :  { %v275_v12 = vrot.slane %v260_v9, 1  ;;  %267 = vrot.lane.b32.xlu1 %v260_v9, %s1224_s12 }
 0x249   :  { %v276_v13 = vsel %vm87_vm6, %v274_v11, %v275_v12 }
 0x24a   :  { %281 = vrot.lane.b32.xlu0 %v276_v13, %s1224_s12 }
 0x24b   :  { %283 = vrot.lane.b32.xlu1 %v275_v12, %s1224_s12 }
 0x24e   :  { %495 = vrot.lane.b32.xlu0 %v1203_v14, %s1218_s26 }
 0x24f   :  { %497 = vrot.lane.b32.xlu1 %v1203_v14, %s1219_s27 }
 0x2b7   :  { %v266_v15 = vpop.permute.xlu0 %265 }
 0x2b8   :  { %v271_v16 = vmax.f32 %v257_v6, %v266_v15  ;;  %v1214_v6 = vld [vmem:[%s1559_s1 + $0x50] sm:$0xff]  }
 0x2b9   :  { %v268_v17 = vpop.permute.xlu1 %267 }
 0x2ba   :  { %v272_v18 = vmax.f32 %v260_v9, %v268_v17  ;;  %v279_v19 = vmax.f32 %v271_v16, %v276_v13  ;;  %v1217_v9 = vld [vmem:[%s1559_s1 + $0x68] ss:$0 sps:$4 sm:$0xff]  }
 0x2bb   :  { %v666_v10 = vsel %vm218_vm1, %v1217_v9, 0  ;;  %vm469_vm1 = vcmask 523264  }
 0x2bc   :  { %v282_v20 = vpop.permute.xlu0 %281  ;;  %v280_v21 = vmax.f32 %v272_v18, %v275_v12 }
 0x2bd   :  { %v287_v22 = vmax.f32 %v279_v19, %v282_v20  ;;  %v284_v23 = vpop.permute.xlu1 %283 }
 0x2be   :  { %v288_v24 = vmax.f32 %v280_v21, %v284_v23 }
 0x2bf   :  { %1063 = vmatprep.mubr.msk.f32.mxu1 %vm304_vm11, %v287_v22 }
 0x2c0   :  { %1064 = vmatmul.mubr.msk.f32.vlgmr.msra.gmra.mrb[0].mxu1 %vm304_vm11, %v288_v24  ;;  %v496_v26 = vpop.permute.xlu0 %495 }
 0x2c1   :  { %v498_v27 = vpop.permute.xlu1 %497  ;;  %1070 = vmatprep.mubr.msk.f32.mxu1 %vm1227_vm13, %v1226_v30 }
 0x2c2   :  { %v501_v28 = vsel %vm42_vm0, %v496_v26, %v498_v27  ;;  %vm387_vm0 = vcmask 121856  }
 0x2c3   :  { %508 = vrot.lane.b32.xlu1 %v501_v28, %s1222_s10  ;;  %506 = vrot.lane.b32.xlu0 %v501_v28, %s1220_s28  ;;  %v502_v31 = vshrl.u32 %v501_v28, 16  ;;  %v514_v33 = vshll.u32 %v501_v28, 16 }
 0x2c5   :  { %v504_v32 = vrot.slane %v502_v31, 7 }
 0x2c7   :  { %v518_v34 = vshll.u32 %v504_v32, 16  ;;  %v516_v35 = vor.u32 %v514_v33, %v504_v32 }
 0x2c9   :  { %v520_v38 = vsel %vm59_vm3, %v504_v32, %v518_v34 }
 0x2ca   :  { %v539_v43 = vrot.slane %v520_v38, 1  ;;  %v531_v44 = vshll.u32 %v520_v38, 16 }
 0x2cc   :  { %v533_v49 = vrot.slane %v531_v44, 1 }
 0x335   :  { %v509_v36 = vpop.permute.xlu1 %508  ;;  %v507_v37 = vpop.permute.xlu0 %506 }
 0x336   :  { %v512_v39 = vsel %vm54_vm4, %v507_v37, %v509_v36 }
 0x337   :  { %v1433_v40 = vsel %vm1335_vm5, %v512_v39, %v516_v35 }
 0x338   :  { %v526_v41 = vshll.u32 %v1433_v40, 16  ;;  %v538_v42 = vrot.slane %v1433_v40, 1  ;;  %v524_v45 = vshrl.u32 %v1433_v40, 16 }
 0x33a   :  { %v540_v46 = vsel %vm87_vm6, %v538_v42, %v539_v43  ;;  %v528_v47 = vrot.slane %v526_v41, 1 }
 0x33b   :  { %541 = vrot.lane.b32.xlu1 %v540_v46, %s1223_s16 }
 0x33c   :  { %v529_v48 = vor.u32 %v528_v47, %v524_v45 }
 0x33e   :  { %v534_v50 = vsel %vm71_vm7, %v529_v48, %v533_v49 }
 0x33f   :  { %535 = vrot.lane.b32.xlu0 %v534_v50, %s1218_s26 }
 0x393   :  { %v1065_v25 = vpop.f32.mrb[0].mxu1 }
 0x394   :  { %v377_v51 = vpop.f32.mrb[1].mxu1 }
 0x395   :  { %v1142_v53 = vpack.c.bf16 %v1065_v25, %v377_v51 }
 0x397   :  { %1144 = vmatpush3.bf16.msk.msra.mxu1 %vm1443_vm15, %v1142_v53 }
 0x398   :  { %668 = vmatprep.subr.bf16.mxu1 %v1221_v4 }
 0x39a   :  { %1071 = vmatmul.mubr.msk.f32.vlgmr.msra.gmra.mrb[2].mxu1 %vm387_vm0, %v1452_v54 }
 0x39b   :  { %669 = vmatpush1.bf16.msra.mxu1 %v1204_v55 }
 0x39c   :  { %670 = vmatprep.subr.bf16.mxu1 %v1221_v4 }
 0x39f   :  { %671 = vmatpush1.bf16.msra.mxu1 %v1205_v56 }
 0x3a0   :  { %672 = vmatprep.subr.bf16.mxu1 %v1221_v4 }
 0x3a3   :  { %673 = vmatpush1.bf16.msra.mxu1 %v1206_v57 }
 0x3a4   :  { %674 = vmatprep.subr.bf16.mxu1 %v1221_v4 }
 0x3a7   :  { %675 = vmatpush1.bf16.msra.mxu1 %v1207_v58 }
 0x3a8   :  { %676 = vmatprep.subr.bf16.mxu1 %v1221_v4 }
 0x3ab   :  { %677 = vmatpush1.bf16.msra.mxu1 %v1208_v59 }
 0x3ac   :  { %678 = vmatprep.subr.bf16.mxu1 %v1221_v4 }
 0x3ad   :  { %v542_v62 = vpop.permute.xlu1 %541 }
 0x3af   :  { %679 = vmatpush1.bf16.msra.mxu1 %v1209_v60 }
 0x3b0   :  { %680 = vmatprep.subr.bf16.mxu1 %v1221_v4 }
 0x3b1   :  { %v536_v63 = vpop.permute.xlu0 %535 }
 0x3b2   :  { %v547_v0 = vsel %vm97_vm8, %v536_v63, %v542_v62  ;;  %v544_v11 = vsel %vm93_vm9, %v1433_v40, %v536_v63 }
 0x3b3   :  { %681 = vmatpush1.bf16.msra.mxu1 %v1210_v61  ;;  %987 = vmatprep.mubr.msk.bf16.mxu1 %vm215_vm10, %v547_v0 }
 0x3b4   :  { %682 = vmatprep.subr.bf16.mxu1 %v1221_v4 }
 0x3b7   :  { %683 = vmatpush1.bf16.msra.mxu1 %v1211_v1 }
 0x3b8   :  { %684 = vmatprep.subr.bf16.mxu1 %v1221_v4 }
 0x3bb   :  { %685 = vmatpush1.bf16.msra.mxu1 %v1212_v2 }
 0x3bc   :  { %686 = vmatprep.subr.bf16.mxu1 %v1221_v4 }
 0x3bf   :  { %687 = vmatpush1.bf16.msra.mxu1 %v1213_v5 }
 0x3c0   :  { %688 = vmatprep.subr.bf16.mxu1 %v1221_v4 }
 0x3c3   :  { %689 = vmatpush1.bf16.msra.mxu1 %v1214_v6 }
 0x3c4   :  { %690 = vmatprep.subr.bf16.mxu1 %v1221_v4 }
 0x3c7   :  { %691 = vmatpush1.bf16.msra.mxu1 %v1215_v7 }
 0x3c8   :  { %692 = vmatprep.subr.bf16.mxu1 %v1221_v4 }
 0x3cb   :  { %693 = vmatpush1.bf16.msra.mxu1 %v1216_v8  ;;  %v929_v8 = vld [vmem:[%s1562_s6] sm:$0x1] }
 0x3cc   :  { %694 = vmatprep.subr.bf16.mxu1 %v1221_v4 }
 0x3cf   :  { %695 = vmatpush1.bf16.msra.mxu1 %v666_v10 }
 0x3d2   :  { %701 = vmatmul.mubr.bf16.vlgmr.msra.gmra.mrb[4].mxu1 %v544_v11 }
 0x46d   :  { %v460_v12 = vpop.f32.mrb[2].mxu1 }
 0x46e   :  { %v464_v13 = vmax.f32 %v460_v12, 0.0  ;;  %v1072_v14 = vpop.f32.mrb[3].mxu1  ;;  %v933_v12 = vld [vmem:[%s1563_s7] sm:$0x1] }
 0x470   :  { %v465_v15 = vpack.c.bf16 %v464_v13, %v464_v13 }
 0x472   :  { %467 = vst.msk [vmem:[%s1565_s5] sm:$0xf] %vm466_vm2, %v465_v15  ;;  %v468_v38 = vunpack.c.l.bf16 %v465_v15 }
 0x474   :  { %v478_v39 = vmul.f32 %v468_v38, %v468_v38  ;;  %v470_v40 = vsel %vm469_vm1, %v468_v38, 0.0 }
 0x475   :  { %v471_v42 = vrot.slane %v470_v40, 4 }
 0x476   :  { %v479_v41 = vsel %vm469_vm1, %v478_v39, 0.0 }
 0x477   :  { %v480_v43 = vrot.slane %v479_v41, 4  ;;  %v472_v46 = vadd.f32 %v471_v42, %v470_v40 }
 0x479   :  { %v481_v48 = vadd.f32 %v480_v43, %v479_v41  ;;  %v473_v50 = vrot.slane %v472_v46, 2 }
 0x47b   :  { %v482_v52 = vrot.slane %v481_v48, 2  ;;  %v474_v55 = vadd.f32 %v473_v50, %v472_v46 }
 0x47d   :  { %v483_v58 = vadd.f32 %v482_v52, %v481_v48  ;;  %v475_v61 = vrot.slane %v474_v55, 1 }
 0x47f   :  { %v484_v0 = vrot.slane %v483_v58, 1  ;;  %v476_v5 = vadd.f32 %v475_v61, %v474_v55 }
 0x481   :  { %v485_v9 = vadd.f32 %v484_v0, %v483_v58 }
 0x4a5   :  { %v702_v16 = vpop.f32.mrb[4].mxu1 }
 0x4a6   :  { %v703_v4 = vadd.f32 %v1398_v3, %v702_v16  ;;  %v704_v17 = vpop.f32.mrb[5].mxu1 }
 0x4a7   :  { %v705_v18 = vpop.f32.mrb[6].mxu1 }
 0x4a8   :  { %v706_v19 = vadd.f32 %v1398_v3, %v705_v18  ;;  %v707_v20 = vpop.f32.mrb[7].mxu1  ;;  %711 = vrot.lane.b32.xlu0 %v703_v4, %s1224_s12  ;;  %v719_v21 = vrot.slane %v703_v4, 1 }
 0x4aa   :  { %v720_v22 = vrot.slane %v706_v19, 1  ;;  %713 = vrot.lane.b32.xlu1 %v706_v19, %s1224_s12 }
 0x4ac   :  { %v721_v23 = vsel %vm87_vm6, %v719_v21, %v720_v22 }
 0x4ad   :  { %726 = vrot.lane.b32.xlu0 %v721_v23, %s1224_s12 }
 0x4ae   :  { %728 = vrot.lane.b32.xlu1 %v720_v22, %s1224_s12 }
 0x51a   :  { %v712_v24 = vpop.permute.xlu0 %711 }
 0x51b   :  { %v717_v26 = vmax.f32 %v703_v4, %v712_v24 }
 0x51c   :  { %v714_v27 = vpop.permute.xlu1 %713 }
 0x51d   :  { %v718_v28 = vmax.f32 %v706_v19, %v714_v27  ;;  %v724_v29 = vmax.f32 %v717_v26, %v721_v23 }
 0x51f   :  { %v727_v31 = vpop.permute.xlu0 %726  ;;  %v725_v3 = vmax.f32 %v718_v28, %v720_v22 }
 0x520   :  { %v732_v32 = vmax.f32 %v724_v29, %v727_v31  ;;  %v729_v33 = vpop.permute.xlu1 %728 }
 0x521   :  { %v733_v34 = vmax.f32 %v725_v3, %v729_v33 }
 0x522   :  { %1103 = vmatprep.mubr.msk.f32.mxu0 %vm304_vm11, %v732_v32 }
 0x523   :  { %1104 = vmatmul.mubr.msk.f32.vlgmr.msra.gmra.mrb[4].mxu0 %vm304_vm11, %v733_v34 }
 0x524   :  { %1110 = vmatprep.mubr.msk.f32.mxu0 %vm1227_vm13, %v1226_v30 }
 0x5f6   :  { %v1105_v35 = vpop.f32.mrb[4].mxu0 }
 0x5f7   :  { %v821_v36 = vpop.f32.mrb[5].mxu0 }
 0x5f8   :  { %v1174_v37 = vpack.c.bf16 %v1105_v35, %v821_v36 }
 0x5fa   :  { %1176 = vmatpush3.bf16.msk.msra.mxu0 %vm1443_vm15, %v1174_v37 }
 0x5fd   :  { %1111 = vmatmul.mubr.msk.f32.vlgmr.msra.gmra.mrb[6].mxu0 %vm387_vm0, %v1452_v54 }
 0x6d0   :  { %v903_v44 = vpop.f32.mrb[6].mxu0 }
 0x6d1   :  { %v907_v30 = vmax.f32 %v903_v44, 0.0  ;;  %v1112_v45 = vpop.f32.mrb[7].mxu0 }
 0x6d3   :  { %v908_v47 = vpack.c.bf16 %v907_v30, %v907_v30 }
 0x6d5   :  { %992 = vst.msk [vmem:[%s1565_s5 + $0x4] sm:$0xf] %vm466_vm2, %v908_v47  ;;  %v911_v49 = vunpack.c.l.bf16 %v908_v47 }
 0x6d7   :  { %v912_v25 = vsel %vm469_vm1, %v911_v49, 0.0  ;;  %v920_v51 = vmul.f32 %v911_v49, %v911_v49 }
 0x6d8   :  { %v913_v53 = vrot.slane %v912_v25, 4 }
 0x6d9   :  { %v921_v54 = vsel %vm469_vm1, %v920_v51, 0.0 }
 0x6da   :  { %v914_v56 = vadd.f32 %v913_v53, %v912_v25  ;;  %v922_v57 = vrot.slane %v921_v54, 4 }
 0x6dc   :  { %v915_v59 = vrot.slane %v914_v56, 2  ;;  %v923_v60 = vadd.f32 %v922_v57, %v921_v54 }
 0x6de   :  { %v916_v62 = vadd.f32 %v915_v59, %v914_v56  ;;  %v924_v63 = vrot.slane %v923_v60, 2 }
 0x6e0   :  { %v917_v1 = vrot.slane %v916_v62, 1  ;;  %v925_v2 = vadd.f32 %v924_v63, %v923_v60 }
 0x6e2   :  { %v918_v6 = vadd.f32 %v917_v1, %v916_v62  ;;  %v926_v7 = vrot.slane %v925_v2, 1 }
 0x6e4   :  { %v919_v10 = vadd.f32 %v918_v6, %v476_v5  ;;  %v927_v11 = vadd.f32 %v926_v7, %v925_v2 }
 0x6e6   :  { %v928_v13 = vadd.f32 %v927_v11, %v485_v9  ;;  %v930_v14 = vadd.f32 %v929_v8, %v919_v10 }
 0x6e8   :  { %932 = vst.msk [vmem:[%s1562_s6] sm:$0x1] %vm28_vm12, %v930_v14  ;;  %v934_v15 = vadd.f32 %v933_v12, %v928_v13 }
 0x6ea   :  { %935 = vst.msk [vmem:[%s1563_s7] sm:$0x1] %vm28_vm12, %v934_v15 }

// kernel: tile.38
= control target key start
LH: loop header
LB: loop body
LE: loop exit
PB: predicated region body
PF: predicated region fallthrough
CT: control target
= control target key end

     0   :  { %s22_s0 = inlined_call_operand.vmem [shape: f32[8], index: 0, kind: input, shape index: {}]   ;;  %s23_s1 = inlined_call_operand.vmem [shape: f32[8,8], index: 1, kind: output, shape index: {}]  }
   0x1   :  { %v4_v0 = vld [vmem:[%s22_s0] ss:$0 sm:$0xff] }
   0x2   :  { %5 = vst [vmem:[%s23_s1] sm:$0xff] %v4_v0 }

// kernel: tile.39
= control target key start
LH: loop header
LB: loop body
LE: loop exit
PB: predicated region body
PF: predicated region fallthrough
CT: control target
= control target key end

     0   :  { %s67_s10 = smov 56   ;;  %s68_s11 = smov 40   ;;  %vm3_vm0 = vcmask 64512   ;;  %vm9_vm1 = vcmask 523712   ;;  %vm15_vm2 = vcmask 458112   ;;  %vm21_vm3 = vcmask 392512   ;;  %s111_s0 = inlined_call_operand.vmem [shape: f32[8,8], index: 0, kind: input, shape index: {}]   ;;  %s112_s1 = inlined_call_operand.vmem [shape: f32[1,64], index: 1, kind: output, shape index: {}]  }
   0x1   :  { %v53_v0 = vld [vmem:[%s111_s0 + $0x7] sm:$0x1]   ;;  %v55_v1 = vld [vmem:[%s111_s0 + $0x5] sm:$0x1]   ;;  %v54_v2 = vld [vmem:[%s111_s0 + $0x6] sm:$0x1]  }
   0x2   :  { %7 = vrot.lane.b32.xlu0 %v53_v0, %s67_s10  ;;  %19 = vrot.lane.b32.xlu1 %v55_v1, %s68_s11  ;;  %v56_v3 = vld [vmem:[%s111_s0 + $0x4] sm:$0x1]   ;;  %v2_v4 = vld [vmem:[%s111_s0] sm:$0x1]   ;;  %s69_s18 = smov 48   ;;  %s70_s19 = smov 32  }
   0x3   :  { %4 = vst.msk [vmem:[#allocation0] sm:$0x1] %vm3_vm0, %v2_v4   ;;  %v57_v5 = vld [vmem:[%s111_s0 + $0x3] sm:$0x1]   ;;  %v58_v6 = vld [vmem:[%s111_s0 + $0x2] sm:$0x1]  }
   0x4   :  { %s71_s24 = smov 24   ;;  %s72_s25 = smov 16   ;;  %v59_v7 = vld [vmem:[%s111_s0 + $0x1] sm:$0x1]   ;;  %vm27_vm4 = vcmask 326912   ;;  %vm33_vm5 = vcmask 261312  }
   0x5   :  { %s73_s0 = smov 8   ;;  %vm39_vm6 = vcmask 195712   ;;  %vm45_vm7 = vcmask 130112  }
   0x6   :  { %13 = vrot.lane.b32.xlu0 %v54_v2, %s69_s18  ;;  %25 = vrot.lane.b32.xlu1 %v56_v3, %s70_s19 }
   0xa   :  { %31 = vrot.lane.b32.xlu0 %v57_v5, %s71_s24  ;;  %37 = vrot.lane.b32.xlu1 %v58_v6, %s72_s25 }
   0xe   :  { %43 = vrot.lane.b32.xlu0 %v59_v7, %s73_s0 }
  0x74   :  { %v8_v8 = vpop.permute.xlu0 %7   ;;  %v20_v9 = vpop.permute.xlu1 %19  }
  0x75   :  { %10 = vst.msk [vmem:[#allocation0] sm:$0x1] %vm9_vm1, %v8_v8  }
  0x78   :  { %v14_v10 = vpop.permute.xlu0 %13   ;;  %v26_v11 = vpop.permute.xlu1 %25  }
  0x79   :  { %16 = vst.msk [vmem:[#allocation0] sm:$0x1] %vm15_vm2, %v14_v10  }
  0x7a   :  { %22 = vst.msk [vmem:[#allocation0] sm:$0x1] %vm21_vm3, %v20_v9  }
  0x7b   :  { %28 = vst.msk [vmem:[#allocation0] sm:$0x1] %vm27_vm4, %v26_v11  }
  0x7c   :  { %v32_v12 = vpop.permute.xlu0 %31   ;;  %v38_v13 = vpop.permute.xlu1 %37  }
  0x7d   :  { %34 = vst.msk [vmem:[#allocation0] sm:$0x1] %vm33_vm5, %v32_v12  }
  0x7e   :  { %40 = vst.msk [vmem:[#allocation0] sm:$0x1] %vm39_vm6, %v38_v13  }
  0x80   :  { %v44_v14 = vpop.permute.xlu0 %43  }
  0x81   :  { %46 = vst.msk [vmem:[#allocation0] sm:$0x1] %vm45_vm7, %v44_v14  }
  0x88   :  { %v50_v15 = vld [vmem:[#allocation0] sm:$0x1] }
  0x89   :  { %52 = vst [vmem:[%s112_s1] sm:$0x1] %v50_v15 }

// kernel: cnn_in_polar_coords.5
= control target key start
LH: loop header
LB: loop body
LE: loop exit
PB: predicated region body
PF: predicated region fallthrough
CT: control target
= control target key end

     0   :  { %s263_s12 = smov 0   ;;  %s299_s0 = inlined_call_operand.vmem [shape: bf16[2,8,64], index: 0, kind: input, shape index: {}]   ;;  %s300_s1 = inlined_call_operand.vmem [shape: f32[1,64], index: 1, kind: input, shape index: {}]   ;;  %s301_s2 = inlined_call_operand.vmem [shape: f32[1,64], index: 2, kind: input, shape index: {}]   ;;  %s302_s3 = inlined_call_operand.vmem [shape: bf16[2,8,64], index: 3, kind: output, shape index: {}]  }
   0x1 LB: > { %s240_s13 = sadd.s32 4294967295, %s265_s12   ;;  %p244_p0 = scmp.ge.s32.totalorder %s265_s12, 1  ;;  %s265_s12 = sphi %s263_s12, %s13_s12  }
   0x2   : > { %p136_p1 = scmp.lt.s32.totalorder %s265_s12, 3 }
   0x4   : > { %p137_p2 = pnand %p244_p0, %p136_p1 }
   0x5   : > { %p158_p3 = scmp.lt.s32.totalorder (!%p137_p2), %s240_s13, 1  ;;  %v247_v1 = vld [vmem:[%s300_s1] ss:$0 sm:$0xff] (!%p137_p2)  ;;  %vm185_vm0 = vcmask (!%p137_p2), 519168  }
   0x6   : > { %140 = sbr.rel (%p137_p2) target bundleno = 26 (0x1a), region = 32  ;;  %v248_v3 = vld [vmem:[%s301_s2] ss:$0 sm:$0xff] (!%p137_p2) }
   0xd   : > { %s304_s13 = smov (!%p158_p3, %s240_s13), 1 }
   0xe   : > { %s245_s14 = sshll.u32 %s304_s13, 2 }
   0xf   : > { %s161_s17 = scalar_lea.vmem %s299_s0, %s245_s14  ;;  %s165_s24 = scalar_lea.vmem %s302_s3, %s245_s14 }
  0x10   : > { %v166_v0 = vld [vmem:[%s161_s17] sm:$0xf] }
  0x11   : > { %v167_v2 = vunpack.c.l.bf16 %v166_v0 }
  0x13   : > { %v175_v4 = vmul.f32 %v247_v1, %v167_v2 }
  0x15   : > { %v183_v5 = vadd.f32 %v248_v3, %v175_v4 }
  0x17   : > { %v184_v6 = vpack.c.bf16 %v183_v5, %v183_v5 }
  0x19   : > { %186 = vst.msk [vmem:[%s165_s24] sm:$0xf] %vm185_vm0, %v184_v6 }
  0x1a PF: > { %s13_s12 = sadd.s32 1, %s265_s12  }
  0x1b   : > { %p10_p4 = scmp.ge.s32.totalorder %s13_s12, 4  }
  0x1d   :  { %12 = sbr.rel (!%p10_p4) target bundleno = 1 (0x1), region = 62 }

// kernel: tile.48
= control target key start
LH: loop header
LB: loop body
LE: loop exit
PB: predicated region body
PF: predicated region fallthrough
CT: control target
= control target key end

     0   :  { %s22_s0 = inlined_call_operand.vmem [shape: f32[16], index: 0, kind: input, shape index: {}]   ;;  %s23_s1 = inlined_call_operand.vmem [shape: f32[8,16], index: 1, kind: output, shape index: {}]  }
   0x1   :  { %v4_v0 = vld [vmem:[%s22_s0] ss:$0 sm:$0xff] }
   0x2   :  { %5 = vst [vmem:[%s23_s1] sm:$0xff] %v4_v0 }

// kernel: tile.49
= control target key start
LH: loop header
LB: loop body
LE: loop exit
PB: predicated region body
PF: predicated region fallthrough
CT: control target
= control target key end

     0   :  { %s67_s10 = smov 112   ;;  %s68_s11 = smov 80   ;;  %vm3_vm0 = vcmask 130048   ;;  %vm9_vm1 = vcmask 1048448   ;;  %vm15_vm2 = vcmask 917248   ;;  %vm21_vm3 = vcmask 786048   ;;  %s111_s0 = inlined_call_operand.vmem [shape: f32[8,16], index: 0, kind: input, shape index: {}]   ;;  %s112_s1 = inlined_call_operand.vmem [shape: f32[1,128], index: 1, kind: output, shape index: {}]  }
   0x1   :  { %v53_v0 = vld [vmem:[%s111_s0 + $0x7] sm:$0x1]   ;;  %v55_v1 = vld [vmem:[%s111_s0 + $0x5] sm:$0x1]   ;;  %v54_v2 = vld [vmem:[%s111_s0 + $0x6] sm:$0x1]  }
   0x2   :  { %7 = vrot.lane.b32.xlu0 %v53_v0, %s67_s10  ;;  %19 = vrot.lane.b32.xlu1 %v55_v1, %s68_s11  ;;  %v56_v3 = vld [vmem:[%s111_s0 + $0x4] sm:$0x1]   ;;  %v2_v4 = vld [vmem:[%s111_s0] sm:$0x1]   ;;  %s69_s18 = smov 96   ;;  %s70_s19 = smov 64  }
   0x3   :  { %4 = vst.msk [vmem:[#allocation0] sm:$0x1] %vm3_vm0, %v2_v4   ;;  %v57_v5 = vld [vmem:[%s111_s0 + $0x3] sm:$0x1]   ;;  %v58_v6 = vld [vmem:[%s111_s0 + $0x2] sm:$0x1]  }
   0x4   :  { %s71_s24 = smov 48   ;;  %s72_s25 = smov 32   ;;  %v59_v7 = vld [vmem:[%s111_s0 + $0x1] sm:$0x1]   ;;  %vm27_vm4 = vcmask 654848   ;;  %vm33_vm5 = vcmask 523648  }
   0x5   :  { %s73_s0 = smov 16   ;;  %vm39_vm6 = vcmask 392448   ;;  %vm45_vm7 = vcmask 261248  }
   0x6   :  { %13 = vrot.lane.b32.xlu0 %v54_v2, %s69_s18  ;;  %25 = vrot.lane.b32.xlu1 %v56_v3, %s70_s19 }
   0xa   :  { %31 = vrot.lane.b32.xlu0 %v57_v5, %s71_s24  ;;  %37 = vrot.lane.b32.xlu1 %v58_v6, %s72_s25 }
   0xe   :  { %43 = vrot.lane.b32.xlu0 %v59_v7, %s73_s0 }
  0x74   :  { %v8_v8 = vpop.permute.xlu0 %7   ;;  %v20_v9 = vpop.permute.xlu1 %19  }
  0x75   :  { %10 = vst.msk [vmem:[#allocation0] sm:$0x1] %vm9_vm1, %v8_v8  }
  0x78   :  { %v14_v10 = vpop.permute.xlu0 %13   ;;  %v26_v11 = vpop.permute.xlu1 %25  }
  0x79   :  { %16 = vst.msk [vmem:[#allocation0] sm:$0x1] %vm15_vm2, %v14_v10  }
  0x7a   :  { %22 = vst.msk [vmem:[#allocation0] sm:$0x1] %vm21_vm3, %v20_v9  }
  0x7b   :  { %28 = vst.msk [vmem:[#allocation0] sm:$0x1] %vm27_vm4, %v26_v11  }
  0x7c   :  { %v32_v12 = vpop.permute.xlu0 %31   ;;  %v38_v13 = vpop.permute.xlu1 %37  }
  0x7d   :  { %34 = vst.msk [vmem:[#allocation0] sm:$0x1] %vm33_vm5, %v32_v12  }
  0x7e   :  { %40 = vst.msk [vmem:[#allocation0] sm:$0x1] %vm39_vm6, %v38_v13  }
  0x80   :  { %v44_v14 = vpop.permute.xlu0 %43  }
  0x81   :  { %46 = vst.msk [vmem:[#allocation0] sm:$0x1] %vm45_vm7, %v44_v14  }
  0x88   :  { %v50_v15 = vld [vmem:[#allocation0] sm:$0x1] }
  0x89   :  { %52 = vst [vmem:[%s112_s1] sm:$0x1] %v50_v15 }

// kernel: tile.53
= control target key start
LH: loop header
LB: loop body
LE: loop exit
PB: predicated region body
PF: predicated region fallthrough
CT: control target
= control target key end

     0   :  { %s22_s0 = inlined_call_operand.vmem [shape: f32[16], index: 0, kind: input, shape index: {}]   ;;  %s23_s1 = inlined_call_operand.vmem [shape: f32[4,16], index: 1, kind: output, shape index: {}]  }
   0x1   :  { %v4_v0 = vld [vmem:[%s22_s0] ss:$0 sm:$0xff] }
   0x2   :  { %5 = vst [vmem:[%s23_s1] sm:$0xf] %v4_v0 }

// kernel: cnn_in_polar_coords.6
= control target key start
LH: loop header
LB: loop body
LE: loop exit
PB: predicated region body
PF: predicated region fallthrough
CT: control target
= control target key end

     0   :  { %s1416_s26 = smov 96   ;;  %s1417_s27 = smov 32   ;;  %vm39_vm0 = vcmask 261120   ;;  %vm46_vm1 = vcmask 1043456   ;;  %v1419_v7 = vmov 0.0   ;;  %vm1420_vm2 = vmmov 0   ;;  %s1807_s0 = inlined_call_operand.vmem [shape: bf16[2,8,64], index: 0, kind: input, shape index: {}]   ;;  %s1808_s1 = inlined_call_operand.vmem [shape: bf16[288,128], index: 1, kind: input, shape index: {}]   ;;  %s1809_s2 = inlined_call_operand.vmem [shape: f32[1,128], index: 2, kind: input, shape index: {}]   ;;  %s1810_s3 = inlined_call_operand.vmem [shape: f32[112,64], index: 3, kind: input, shape index: {}]   ;;  %s1811_s4 = inlined_call_operand.vmem [shape: f32[3,6], index: 4, kind: input, shape index: {}]   ;;  %s1812_s5 = inlined_call_operand.vmem [shape: bf16[2,3,64], index: 5, kind: output, shape index: {0}]   ;;  %s1813_s6 = inlined_call_operand.vmem [shape: f32[1,64], index: 6, kind: output, shape index: {1}]   ;;  %s1814_s7 = inlined_call_operand.vmem [shape: f32[1,64], index: 7, kind: output, shape index: {2}]  }
   0x1   :  { %v1378_v0 = vld [vmem:[%s1807_s0] ss:$0 sps:$4 sm:$0xff]   ;;  %s1418_s28 = smov 80   ;;  %1238 = vmatprep.subr.bf16.mxu1 %v1419_v7  ;;  %1242 = vmatprep.mubr.msk.bf16.mxu1 %vm1420_vm2, %v1419_v7  ;;  %v1381_v10 = vld [vmem:[%s1808_s1 + $0x48] sm:$0xff]   ;;  %s1421_s12 = smov 48   ;;  %v1383_v12 = vld [vmem:[%s1808_s1 + $0x50] sm:$0xff]  }
   0x2   :  { %35 = vrot.lane.b32.xlu0 %v1378_v0, %s1416_s26  ;;  %v1379_v8 = vld [vmem:[%s1808_s1 + $0x40] sm:$0xff]   ;;  %v1382_v11 = vld [vmem:[%s1808_s1 + $0x8] sm:$0xff]   ;;  %v1384_v13 = vld [vmem:[%s1808_s1 + $0x10] sm:$0xff]   ;;  %vm66_vm3 = vcmask 1040384   ;;  %vm67_vm4 = vsmask.f32 256 }
   0x3   :  { %v1380_v9 = vld [vmem:[%s1808_s1] sm:$0xff]   ;;  %1154 = vmatprep.subr.bf16.mxu0 %v1379_v8  ;;  %v1385_v14 = vld [vmem:[%s1808_s1 + $0x58] sm:$0xff]   ;;  %v1392_v18 = vld [vmem:[%s1808_s1 + $0x88] sm:$0xff]   ;;  %vm54_vm5 = vcmask 392192   ;;  %s1422_s24 = smov 64   ;;  %vm87_vm7 = vcmask 523264  }
   0x4   :  { %1155 = vmatpush3.bf16.msra.mxu0 %v1380_v9  ;;  %v1389_v15 = vld [vmem:[%s1808_s1 + $0x80] sm:$0xff]   ;;  %v1386_v16 = vld [vmem:[%s1808_s1 + $0x18] sm:$0xff]   ;;  %v1390_v20 = vld [vmem:[%s1808_s1 + $0x68] sm:$0xff]   ;;  %vm83_vm8 = vcmask 785408   ;;  %s1423_s30 = smov 16   ;;  %v1424_v56 = vmov 0.0|0.0  }
   0x5   :  { %1156 = vmatprep.subr.bf16.mxu0 %v1381_v10  ;;  %v1387_v17 = vld [vmem:[%s1808_s1 + $0x60] sm:$0xff]   ;;  %1239 = vmatpush3.bf16.msra.mxu1 %v1389_v15  ;;  %v1391_v21 = vld [vmem:[%s1808_s1 + $0x28] sm:$0xff]   ;;  %v1393_v22 = vld [vmem:[%s1808_s1 + $0x70] sm:$0xff]   ;;  %s1425_s14 = smov 112   ;;  %vm384_vm9 = vcmask 916480   ;;  %vm463_vm10 = vcmask 1045504  }
   0x6   :  { %37 = vrot.lane.b32.xlu0 %v1378_v0, %s1417_s27  ;;  %1240 = vmatprep.subr.bf16.mxu1 %v1419_v7  ;;  %v1388_v19 = vld [vmem:[%s1808_s1 + $0x20] sm:$0xff]   ;;  %v1394_v23 = vld [vmem:[%s1808_s1 + $0x30] sm:$0xff]   ;;  %v1395_v25 = vld [vmem:[%s1808_s1 + $0x78] sm:$0xff]   ;;  %vm459_vm11 = vcmask 48128   ;;  %vm539_vm12 = vcmask 517120   ;;  %vm28_vm15 = vcmask 516096  }
   0x7   :  { %v1396_v26 = vld [vmem:[%s1808_s1 + $0x38] sm:$0xff]   ;;  %vm1534_vm6 = vmand %vm66_vm3, %vm67_vm4  ;;  %v1553_v49 = vld [vmem:[%s1809_s2] ss:$0 sm:$0xff]  ;;  %vm540_vm13 = vsmask.f32 1280 }
   0x8   :  { %1157 = vmatpush3.bf16.msra.mxu0 %v1382_v11  ;;  %v370_v57 = vld [vmem:[%s1810_s3] sm:$0xff]  ;;  %v371_v58 = vld [vmem:[%s1810_s3 + $0x8] sm:$0xff]  ;;  %v372_v59 = vld [vmem:[%s1810_s3 + $0x10] sm:$0xff]  ;;  %29 = vst.msk [vmem:[%s1813_s6] sm:$0x1] %vm28_vm15, %v1419_v7 }
   0x9   :  { %1158 = vmatprep.subr.bf16.mxu0 %v1383_v12  ;;  %1241 = vmatpush3.bf16.msra.mxu1 %v1392_v18  ;;  %v1567_v60 = vpack.c.bf16 %v371_v58, %v370_v57  ;;  %v373_v61 = vld [vmem:[%s1810_s3 + $0x18] sm:$0xff]  ;;  %v374_v63 = vld [vmem:[%s1810_s3 + $0x20] sm:$0xff]  ;;  %v375_v0 = vld [vmem:[%s1810_s3 + $0x28] sm:$0xff]  ;;  %30 = vst.msk [vmem:[%s1814_s7] sm:$0x1] %vm28_vm15, %v1419_v7 }
   0xa   :  { %1326 = vmatprep.subr.bf16.mxu1 %v1424_v56  ;;  %v1573_v62 = vpack.c.bf16 %v373_v61, %v372_v59  ;;  %v380_v9 = vld [vmem:[%s1810_s3 + $0x50] sm:$0xff]  ;;  %v381_v10 = vld [vmem:[%s1810_s3 + $0x58] sm:$0xff]  ;;  %v1397_v18 = vld [vmem:[%s1807_s0 + $0x4] ss:$0 sps:$4 sm:$0xff]  }
   0xb   :  { %v1614_v11 = vpack.c.bf16 %v381_v10, %v380_v9  ;;  %v1407_v57 = vld [vmem:[%s1808_s1 + $0x20] sm:$0xff]   ;;  %v1409_v58 = vld [vmem:[%s1808_s1 + $0x68] sm:$0xff]   ;;  %v1412_v61 = vld [vmem:[%s1808_s1 + $0x70] sm:$0xff]  }
   0xc   :  { %1159 = vmatpush3.bf16.msra.mxu0 %v1384_v13  ;;  %v382_v13 = vld [vmem:[%s1810_s3 + $0x60] sm:$0xff]  ;;  %v1410_v59 = vld [vmem:[%s1808_s1 + $0x28] sm:$0xff]   ;;  %vm1739_vm14 = vmand %vm539_vm12, %vm540_vm13 }
   0xd   :  { %1160 = vmatprep.subr.bf16.mxu0 %v1385_v14  ;;  %v383_v14 = vld [vmem:[%s1810_s3 + $0x68] sm:$0xff]  ;;  %v1408_v30 = vld [vmem:[%s1808_s1 + $0x80] sm:$0xff]  }
   0xe   :  { %v1626_v15 = vpack.c.bf16 %v383_v14, %v382_v13 }
  0x10   :  { %1161 = vmatpush3.bf16.msra.mxu0 %v1386_v16 }
  0x11   :  { %1162 = vmatprep.subr.bf16.mxu0 %v1387_v17 }
  0x14   :  { %1163 = vmatpush3.bf16.msra.mxu0 %v1388_v19 }
  0x15   :  { %1164 = vmatprep.subr.bf16.mxu0 %v1390_v20 }
  0x18   :  { %1165 = vmatpush3.bf16.msra.mxu0 %v1391_v21 }
  0x19   :  { %1166 = vmatprep.subr.bf16.mxu0 %v1393_v22 }
  0x1c   :  { %1167 = vmatpush3.bf16.msra.mxu0 %v1394_v23 }
  0x1d   :  { %1168 = vmatprep.subr.bf16.mxu0 %v1395_v25 }
  0x20   :  { %1169 = vmatpush3.bf16.msra.mxu0 %v1396_v26 }
  0x21   :  { %1277 = vmatprep.subr.mxu0 %v1419_v7 }
  0x74   :  { %v36_v1 = vpop.permute.xlu0 %35 }
  0x78   :  { %v38_v2 = vpop.permute.xlu0 %37 }
  0x79   :  { %v42_v3 = vsel %vm39_vm0, %v36_v1, %v38_v2  ;;  %v1584_v1 = vpack.c.bf16 %v375_v0, %v374_v63  ;;  %v376_v2 = vld [vmem:[%s1810_s3 + $0x30] sm:$0xff] }
  0x7a   :  { %v43_v4 = vshrl.u32 %v42_v3, 16  ;;  %v1413_v63 = vld [vmem:[%s1808_s1 + $0x30] sm:$0xff]  }
  0x7c   :  { %v45_v5 = vrot.slane %v43_v4, 7 }
  0x7e   :  { %v48_v6 = vsel %vm46_vm1, %v42_v3, %v45_v5  ;;  %v377_v3 = vld [vmem:[%s1810_s3 + $0x38] sm:$0xff]  ;;  %v378_v5 = vld [vmem:[%s1810_s3 + $0x40] sm:$0xff] }
  0x7f   :  { %50 = vrot.lane.b32.xlu1 %v48_v6, %s1418_s28  ;;  %v59_v24 = vshrl.u32 %v48_v6, 16  ;;  %v62_v29 = vshll.u32 %v48_v6, 16  ;;  %v1594_v4 = vpack.c.bf16 %v377_v3, %v376_v2  ;;  %v1414_v2 = vld [vmem:[%s1808_s1 + $0x78] sm:$0xff]  }
  0x80   :  { %v1415_v3 = vld [vmem:[%s1808_s1 + $0x38] sm:$0xff]  }
  0x81   :  { %v61_v27 = vrot.slane %v59_v24, 7 }
  0x83   :  { %52 = vrot.lane.b32.xlu1 %v48_v6, %s1421_s12  ;;  %v64_v32 = vor.u32 %v62_v29, %v61_v27  ;;  %v379_v6 = vld [vmem:[%s1810_s3 + $0x48] sm:$0xff] }
  0x84   :  { %v1604_v8 = vpack.c.bf16 %v379_v6, %v378_v5 }
  0xf1   :  { %v51_v28 = vpop.permute.xlu1 %50 }
  0xf5   :  { %v53_v31 = vpop.permute.xlu1 %52 }
  0xf6   :  { %v57_v33 = vsel %vm54_vm5, %v51_v28, %v53_v31 }
  0xf7   :  { %v69_v34 = vsel %vm1534_vm6, %v57_v33, %v64_v32 }
  0xf8   :  { %v80_v35 = vrot.slane %v69_v34, 1  ;;  %v73_v36 = vshll.u32 %v69_v34, 16  ;;  %v71_v37 = vshrl.u32 %v69_v34, 16 }
  0xfa   :  { %81 = vrot.lane.b32.xlu1 %v80_v35, %s1422_s24  ;;  %v75_v38 = vrot.slane %v73_v36, 1 }
  0xfc   :  { %v76_v39 = vor.u32 %v75_v38, %v71_v37 }
  0xfe   :  { %77 = vrot.lane.b32.xlu0 %v76_v39, %s1416_s26 }
 0x16c   :  { %v82_v40 = vpop.permute.xlu1 %81 }
 0x16d   :  { %1243 = vmatmul.mubr.msk.bf16.vlgmr.msra.gmra.mrb[0].mxu1 %vm39_vm0, %v82_v40 }
 0x16e   :  { %1274 = vmatprep.mubr.msk.f32.mxu1 %vm1420_vm2, %v1419_v7  ;;  %1328 = vmatpush3.bf16.msra.mxu1 %v1567_v60 }
 0x16f   :  { %1329 = vmatprep.subr.bf16.mxu1 %v1424_v56 }
 0x170   :  { %v78_v41 = vpop.permute.xlu0 %77 }
 0x171   :  { %v89_v42 = vsel %vm87_vm7, %v78_v41, %v82_v40  ;;  %v85_v43 = vsel %vm83_vm8, %v69_v34, %v78_v41 }
 0x172   :  { %276 = vmatprep.mubr.bf16.mxu0 %v89_v42  ;;  %1331 = vmatpush3.bf16.msra.mxu1 %v1573_v62 }
 0x173   :  { %277 = vmatmul.mubr.bf16.vlgmr.msra.gmra.mrb[0].mxu0 %v85_v43  ;;  %1332 = vmatprep.subr.bf16.mxu1 %v1424_v56 }
 0x174   :  { %1279 = vmatprep.mubr.msk.f32.mxu0 %vm1420_vm2, %v1419_v7 }
 0x176   :  { %1334 = vmatpush3.bf16.msra.mxu1 %v1584_v1 }
 0x177   :  { %1335 = vmatprep.subr.bf16.mxu1 %v1424_v56 }
 0x17a   :  { %1337 = vmatpush3.bf16.msra.mxu1 %v1594_v4 }
 0x17b   :  { %1338 = vmatprep.subr.bf16.mxu1 %v1424_v56 }
 0x17e   :  { %1340 = vmatpush3.bf16.msra.mxu1 %v1604_v8 }
 0x17f   :  { %1341 = vmatprep.subr.bf16.mxu1 %v1424_v56 }
 0x182   :  { %1343 = vmatpush3.bf16.msra.mxu1 %v1614_v11 }
 0x183   :  { %1344 = vmatprep.subr.bf16.mxu1 %v1424_v56 }
 0x186   :  { %1346 = vmatpush3.bf16.msra.mxu1 %v1626_v15 }
 0x240   :  { %v318_v44 = vpop.f32.mrb[0].mxu1 }
 0x241   :  { %v1244_v45 = vpop.f32.mrb[1].mxu1 }
 0x242   :  { %v321_v46 = vpop.f32.mrb[2].mxu1 }
 0x243   :  { %v1245_v47 = vpop.f32.mrb[3].mxu1  ;;  %v1398_v46 = vld [vmem:[%s1808_s1 + $0x40] sm:$0xff]  }
 0x244   :  { %v1399_v47 = vld [vmem:[%s1808_s1] sm:$0xff]   ;;  %1196 = vmatprep.subr.bf16.mxu1 %v1398_v46 }
 0x246   :  { %v1170_v48 = vpop.f32.mrb[0].mxu0 }
 0x247   :  { %v1171_v50 = vpop.f32.mrb[1].mxu0 }
 0x248   :  { %v1172_v51 = vadd.f32 %v1171_v50, %v1170_v48  ;;  %v1173_v52 = vpop.f32.mrb[2].mxu0  ;;  %v1400_v48 = vld [vmem:[%s1808_s1 + $0x48] sm:$0xff]  }
 0x249   :  { %v1174_v53 = vpop.f32.mrb[3].mxu0  ;;  %v1401_v50 = vld [vmem:[%s1808_s1 + $0x8] sm:$0xff]   ;;  %v1403_v52 = vld [vmem:[%s1808_s1 + $0x10] sm:$0xff]  }
 0x24a   :  { %v279_v54 = vadd.f32 %v1172_v51, %v1553_v49  ;;  %v1402_v51 = vld [vmem:[%s1808_s1 + $0x50] sm:$0xff]   ;;  %v1404_v53 = vld [vmem:[%s1808_s1 + $0x58] sm:$0xff]  }
 0x24c   :  { %v319_v55 = vadd.f32 %v318_v44, %v279_v54  ;;  %v1405_v54 = vld [vmem:[%s1808_s1 + $0x18] sm:$0xff]  }
 0x24e   :  { %325 = vrot.lane.b32.xlu0 %v319_v55, %s1423_s30  ;;  %v1406_v55 = vld [vmem:[%s1808_s1 + $0x60] sm:$0xff]  }
 0x2c0   :  { %v326_v12 = vpop.permute.xlu0 %325 }
 0x2c1   :  { %333 = vrot.lane.b32.xlu0 %v326_v12, %s1416_s26  ;;  %329 = vrot.lane.b32.xlu1 %v326_v12, %s1425_s14  ;;  %v340_v16 = vrot.slane %v326_v12, 1  ;;  %v355_v17 = vrot.slane %v326_v12, 2 }
 0x2c5   :  { %343 = vrot.lane.b32.xlu0 %v340_v16, %s1425_s14  ;;  %335 = vrot.lane.b32.xlu1 %v326_v12, %s1416_s26 }
 0x2c9   :  { %350 = vrot.lane.b32.xlu0 %v340_v16, %s1416_s26  ;;  %348 = vrot.lane.b32.xlu1 %v340_v16, %s1416_s26 }
 0x2cd   :  { %363 = vrot.lane.b32.xlu0 %v355_v17, %s1416_s26  ;;  %358 = vrot.lane.b32.xlu1 %v355_v17, %s1425_s14 }
 0x2d1   :  { %365 = vrot.lane.b32.xlu1 %v355_v17, %s1416_s26  ;;  %569 = vrot.lane.b32.xlu0 %v1397_v18, %s1416_s26 }
 0x2d5   :  { %571 = vrot.lane.b32.xlu1 %v1397_v18, %s1417_s27 }
 0x333   :  { %v334_v19 = vpop.permute.xlu0 %333  ;;  %v330_v20 = vpop.permute.xlu1 %329 }
 0x334   :  { %v332_v21 = vmax.f32 %v326_v12, %v330_v20 }
 0x337   :  { %v344_v22 = vpop.permute.xlu0 %343  ;;  %v336_v23 = vpop.permute.xlu1 %335 }
 0x338   :  { %v337_v24 = vsel %vm83_vm8, %v334_v19, %v336_v23 }
 0x339   :  { %v339_v25 = vmax.f32 %v332_v21, %v337_v24  ;;  %v458_v21 = vld [vmem:[%s1811_s4] sm:$0x7]  ;;  %v1411_v24 = vld [vmem:[%s1808_s1 + $0x88] sm:$0xff]  }
 0x33b   :  { %v342_v26 = vmax.f32 %v339_v25, %v340_v16  ;;  %v351_v27 = vpop.permute.xlu0 %350  ;;  %v349_v28 = vpop.permute.xlu1 %348 }
 0x33c   :  { %v352_v31 = vsel %vm83_vm8, %v349_v28, %v351_v27 }
 0x33d   :  { %v346_v29 = vmax.f32 %v342_v26, %v344_v22 }
 0x33f   :  { %v354_v32 = vmax.f32 %v346_v29, %v352_v31  ;;  %v359_v33 = vpop.permute.xlu1 %358  ;;  %v364_v34 = vpop.permute.xlu0 %363 }
 0x341   :  { %v357_v35 = vmax.f32 %v354_v32, %v355_v17 }
 0x343   :  { %v361_v36 = vmax.f32 %v357_v35, %v359_v33  ;;  %v366_v37 = vpop.permute.xlu1 %365  ;;  %v570_v40 = vpop.permute.xlu0 %569 }
 0x344   :  { %v367_v38 = vsel %vm83_vm8, %v364_v34, %v366_v37 }
 0x345   :  { %v369_v39 = vmax.f32 %v361_v36, %v367_v38 }
 0x347   :  { %1275 = vmatmul.mubr.msk.f32.vlgmr.msra.gmra.mrb[4].mxu1 %vm384_vm9, %v369_v39  ;;  %v572_v41 = vpop.permute.xlu1 %571 }
 0x348   :  { %v575_v42 = vsel %vm39_vm0, %v570_v40, %v572_v41  ;;  %1197 = vmatpush3.bf16.msra.mxu1 %v1399_v47 }
 0x349   :  { %v576_v43 = vshrl.u32 %v575_v42, 16  ;;  %1198 = vmatprep.subr.bf16.mxu1 %v1400_v48 }
 0x34b   :  { %v578_v44 = vrot.slane %v576_v43, 7 }
 0x34c   :  { %1199 = vmatpush3.bf16.msra.mxu1 %v1401_v50 }
 0x34d   :  { %v580_v45 = vsel %vm46_vm1, %v575_v42, %v578_v44  ;;  %1200 = vmatprep.subr.bf16.mxu1 %v1402_v51 }
 0x34e   :  { %584 = vrot.lane.b32.xlu1 %v580_v45, %s1421_s12  ;;  %582 = vrot.lane.b32.xlu0 %v580_v45, %s1418_s28  ;;  %v590_v0 = vshrl.u32 %v580_v45, 16  ;;  %v593_v6 = vshll.u32 %v580_v45, 16 }
 0x350   :  { %1201 = vmatpush3.bf16.msra.mxu1 %v1403_v52  ;;  %v592_v5 = vrot.slane %v590_v0, 7 }
 0x351   :  { %1202 = vmatprep.subr.bf16.mxu1 %v1404_v53 }
 0x352   :  { %v595_v12 = vor.u32 %v593_v6, %v592_v5 }
 0x354   :  { %1203 = vmatpush3.bf16.msra.mxu1 %v1405_v54 }
 0x355   :  { %1204 = vmatprep.subr.bf16.mxu1 %v1406_v55 }
 0x358   :  { %1205 = vmatpush3.bf16.msra.mxu1 %v1407_v57 }
 0x359   :  { %1206 = vmatprep.subr.bf16.mxu1 %v1409_v58 }
 0x35c   :  { %1207 = vmatpush3.bf16.msra.mxu1 %v1410_v59 }
 0x35d   :  { %1208 = vmatprep.subr.bf16.mxu1 %v1412_v61 }
 0x360   :  { %1209 = vmatpush3.bf16.msra.mxu1 %v1413_v63 }
 0x361   :  { %1210 = vmatprep.subr.bf16.mxu1 %v1414_v2 }
 0x364   :  { %1211 = vmatpush3.bf16.msra.mxu1 %v1415_v3  ;;  %v983_v3 = vld [vmem:[%s1811_s4] sm:$0x7] }
 0x365   :  { %1321 = vmatprep.subr.mxu1 %v1419_v7 }
 0x3c0   :  { %v585_v9 = vpop.permute.xlu1 %584  ;;  %v583_v10 = vpop.permute.xlu0 %582 }
 0x3c1   :  { %v588_v13 = vsel %vm54_vm5, %v583_v10, %v585_v9 }
 0x3c2   :  { %v597_v14 = vsel %vm1534_vm6, %v588_v13, %v595_v12 }
 0x3c3   :  { %v608_v16 = vrot.slane %v597_v14, 1  ;;  %v601_v17 = vshll.u32 %v597_v14, 16  ;;  %v599_v18 = vshrl.u32 %v597_v14, 16 }
 0x3c5   :  { %609 = vrot.lane.b32.xlu1 %v608_v16, %s1422_s24  ;;  %v603_v19 = vrot.slane %v601_v17, 1 }
 0x3c7   :  { %v604_v20 = vor.u32 %v603_v19, %v599_v18 }
 0x3c9   :  { %605 = vrot.lane.b32.xlu0 %v604_v20, %s1416_s26  ;;  %v1152_v20 = vld [vmem:[%s1812_s5 + $0x2] sm:$0x3] }
 0x41a   :  { %v454_v22 = vpop.f32.mrb[4].mxu1 }
 0x41b   :  { %v1276_v23 = vpop.f32.mrb[5].mxu1  ;;  %1278 = vmatpush3.msk.msra.mxu0 %vm463_vm10, %v454_v22 }
 0x41c   :  { %1282 = vmatprep.subr.bf16.mxu0 %v1419_v7  ;;  %1280 = vmatmul.mubr.msk.f32.vlgmr.msra.gmra.mrb[4].mxu0 %vm459_vm11, %v458_v21 }
 0x41d   :  { %1283 = vmatpush3.bf16.msra.mxu0 %v1408_v30  ;;  %1286 = vmatprep.mubr.msk.bf16.mxu0 %vm1420_vm2, %v1419_v7 }
 0x41e   :  { %1284 = vmatprep.subr.bf16.mxu0 %v1419_v7 }
 0x421   :  { %1285 = vmatpush3.bf16.msra.mxu0 %v1411_v24 }
 0x422   :  { %1347 = vmatprep.subr.bf16.mxu0 %v1424_v56 }
 0x437   :  { %v610_v25 = vpop.permute.xlu1 %609 }
 0x438   :  { %1287 = vmatmul.mubr.msk.bf16.vlgmr.msra.gmra.mrb[8].mxu0 %vm39_vm0, %v610_v25  ;;  %vm546_vm0 = vcmask 518144  }
 0x439   :  { %1349 = vmatpush3.bf16.msra.mxu0 %v1567_v60  ;;  %1318 = vmatprep.mubr.msk.f32.mxu0 %vm1420_vm2, %v1419_v7 }
 0x43a   :  { %1350 = vmatprep.subr.bf16.mxu0 %v1424_v56 }
 0x43b   :  { %v606_v26 = vpop.permute.xlu0 %605 }
 0x43c   :  { %v612_v27 = vsel %vm83_vm8, %v597_v14, %v606_v26  ;;  %v615_v28 = vsel %vm87_vm7, %v606_v26, %v610_v25 }
 0x43d   :  { %802 = vmatprep.mubr.bf16.mxu1 %v615_v28  ;;  %1352 = vmatpush3.bf16.msra.mxu0 %v1573_v62 }
 0x43e   :  { %803 = vmatmul.mubr.bf16.vlgmr.msra.gmra.mrb[8].mxu1 %v612_v27  ;;  %1353 = vmatprep.subr.bf16.mxu0 %v1424_v56 }
 0x43f   :  { %1323 = vmatprep.mubr.msk.f32.mxu1 %vm1420_vm2, %v1419_v7 }
 0x441   :  { %1355 = vmatpush3.bf16.msra.mxu0 %v1584_v1 }
 0x442   :  { %1356 = vmatprep.subr.bf16.mxu0 %v1424_v56 }
 0x445   :  { %1358 = vmatpush3.bf16.msra.mxu0 %v1594_v4  ;;  %v542_v4 = vld [vmem:[%s1812_s5] sm:$0x3] }
 0x446   :  { %1359 = vmatprep.subr.bf16.mxu0 %v1424_v56 }
 0x449   :  { %1361 = vmatpush3.bf16.msra.mxu0 %v1604_v8 }
 0x44a   :  { %1362 = vmatprep.subr.bf16.mxu0 %v1424_v56 }
 0x44d   :  { %1364 = vmatpush3.bf16.msra.mxu0 %v1614_v11 }
 0x44e   :  { %1365 = vmatprep.subr.bf16.mxu0 %v1424_v56 }
 0x451   :  { %1367 = vmatpush3.bf16.msra.mxu0 %v1626_v15 }
 0x4ef   :  { %v533_v60 = vpop.f32.mrb[4].mxu0 }
 0x4f0   :  { %v537_v62 = vmax.f32 %v533_v60, 0.0  ;;  %v1281_v1 = vpop.f32.mrb[5].mxu0 }
 0x4f2   :  { %v538_v8 = vpack.c.bf16 %v537_v62, %v537_v62 }
 0x4f4   :  { %v543_v11 = vsel %vm1739_vm14, %v538_v8, %v542_v4  ;;  %v545_v9 = vunpack.c.l.bf16 %v538_v8 }
 0x4f5   :  { %544 = vst [vmem:[%s1812_s5] sm:$0x3] %v543_v11 }
 0x4f6   :  { %v555_v10 = vmul.f32 %v545_v9, %v545_v9  ;;  %v547_v12 = vsel %vm546_vm0, %v545_v9, 0.0 }
 0x4f7   :  { %v548_v14 = vrot.slane %v547_v12, 4 }
 0x4f8   :  { %v556_v13 = vsel %vm546_vm0, %v555_v10, 0.0 }
 0x4f9   :  { %v557_v16 = vrot.slane %v556_v13, 4  ;;  %v549_v19 = vadd.f32 %v548_v14, %v547_v12 }
 0x4fb   :  { %v558_v30 = vadd.f32 %v557_v16, %v556_v13  ;;  %v550_v24 = vrot.slane %v549_v19, 2 }
 0x4fd   :  { %v559_v27 = vrot.slane %v558_v30, 2  ;;  %v551_v62 = vadd.f32 %v550_v24, %v549_v19 }
 0x4ff   :  { %v560_v8 = vadd.f32 %v559_v27, %v558_v30 }
 0x50b   :  { %v844_v56 = vpop.f32.mrb[8].mxu0 }
 0x50c   :  { %v1288_v15 = vpop.f32.mrb[9].mxu0 }
 0x50d   :  { %v847_v31 = vpop.f32.mrb[10].mxu0 }
 0x50e   :  { %v1289_v32 = vpop.f32.mrb[11].mxu0 }
 0x50f   :  { %v561_v32 = vrot.slane %v560_v8, 1 }
 0x511   :  { %v1212_v33 = vpop.f32.mrb[8].mxu1 }
 0x512   :  { %v1213_v34 = vpop.f32.mrb[9].mxu1 }
 0x513   :  { %v1214_v35 = vadd.f32 %v1213_v34, %v1212_v33  ;;  %v1215_v36 = vpop.f32.mrb[10].mxu1 }
 0x514   :  { %v1216_v37 = vpop.f32.mrb[11].mxu1 }
 0x515   :  { %v805_v38 = vadd.f32 %v1214_v35, %v1553_v49 }
 0x517   :  { %v845_v39 = vadd.f32 %v844_v56, %v805_v38  ;;  %v552_v56 = vrot.slane %v551_v62, 1  ;;  %v1084_v38 = vld [vmem:[%s1813_s6] sm:$0x1] }
 0x519   :  { %851 = vrot.lane.b32.xlu0 %v845_v39, %s1423_s30  ;;  %v553_v35 = vadd.f32 %v552_v56, %v551_v62  ;;  %v562_v39 = vadd.f32 %v561_v32, %v560_v8 }
 0x58b   :  { %v852_v40 = vpop.permute.xlu0 %851 }
 0x58c   :  { %859 = vrot.lane.b32.xlu0 %v852_v40, %s1416_s26  ;;  %855 = vrot.lane.b32.xlu1 %v852_v40, %s1425_s14  ;;  %v866_v41 = vrot.slane %v852_v40, 1  ;;  %v881_v42 = vrot.slane %v852_v40, 2 }
 0x590   :  { %869 = vrot.lane.b32.xlu0 %v866_v41, %s1425_s14  ;;  %861 = vrot.lane.b32.xlu1 %v852_v40, %s1416_s26 }
 0x594   :  { %876 = vrot.lane.b32.xlu0 %v866_v41, %s1416_s26  ;;  %874 = vrot.lane.b32.xlu1 %v866_v41, %s1416_s26 }
 0x598   :  { %889 = vrot.lane.b32.xlu0 %v881_v42, %s1416_s26  ;;  %884 = vrot.lane.b32.xlu1 %v881_v42, %s1425_s14 }
 0x59c   :  { %891 = vrot.lane.b32.xlu1 %v881_v42, %s1416_s26 }
 0x5fe   :  { %v860_v49 = vpop.permute.xlu0 %859  ;;  %v856_v43 = vpop.permute.xlu1 %855 }
 0x5ff   :  { %v858_v44 = vmax.f32 %v852_v40, %v856_v43 }
 0x602   :  { %v870_v45 = vpop.permute.xlu0 %869  ;;  %v862_v46 = vpop.permute.xlu1 %861 }
 0x603   :  { %v863_v47 = vsel %vm83_vm8, %v860_v49, %v862_v46 }
 0x604   :  { %v865_v48 = vmax.f32 %v858_v44, %v863_v47 }
 0x606   :  { %v868_v50 = vmax.f32 %v865_v48, %v866_v41  ;;  %v877_v51 = vpop.permute.xlu0 %876  ;;  %v875_v52 = vpop.permute.xlu1 %874 }
 0x607   :  { %v878_v54 = vsel %vm83_vm8, %v875_v52, %v877_v51 }
 0x608   :  { %v872_v53 = vmax.f32 %v868_v50, %v870_v45 }
 0x60a   :  { %v880_v55 = vmax.f32 %v872_v53, %v878_v54  ;;  %v885_v57 = vpop.permute.xlu1 %884  ;;  %v890_v59 = vpop.permute.xlu0 %889 }
 0x60c   :  { %v883_v58 = vmax.f32 %v880_v55, %v881_v42  ;;  %v1088_v42 = vld [vmem:[%s1814_s7] sm:$0x1] }
 0x60e   :  { %v887_v61 = vmax.f32 %v883_v58, %v885_v57  ;;  %v892_v63 = vpop.permute.xlu1 %891 }
 0x60f   :  { %v893_v0 = vsel %vm83_vm8, %v890_v59, %v892_v63 }
 0x610   :  { %v895_v2 = vmax.f32 %v887_v61, %v893_v0 }
 0x612   :  { %1319 = vmatmul.mubr.msk.f32.vlgmr.msra.gmra.mrb[6].mxu0 %vm384_vm9, %v895_v2 }
 0x6e5   :  { %v979_v5 = vpop.f32.mrb[6].mxu0 }
 0x6e6   :  { %v1320_v6 = vpop.f32.mrb[7].mxu0  ;;  %1322 = vmatpush3.msk.msra.mxu1 %vm463_vm10, %v979_v5 }
 0x6e7   :  { %1324 = vmatmul.mubr.msk.f32.vlgmr.msra.gmra.mrb[6].mxu1 %vm459_vm11, %v983_v3 }
 0x7ba   :  { %v1056_v7 = vpop.f32.mrb[6].mxu1 }
 0x7bb   :  { %v1060_v17 = vmax.f32 %v1056_v7, 0.0  ;;  %v1325_v18 = vpop.f32.mrb[7].mxu1 }
 0x7bd   :  { %v1061_v21 = vpack.c.bf16 %v1060_v17, %v1060_v17 }
 0x7bf   :  { %v1064_v22 = vsel %vm1739_vm14, %v1061_v21, %v1152_v20  ;;  %v1066_v23 = vunpack.c.l.bf16 %v1061_v21 }
 0x7c0   :  { %1153 = vst [vmem:[%s1812_s5 + $0x2] sm:$0x3] %v1064_v22 }
 0x7c1   :  { %v1067_v25 = vsel %vm546_vm0, %v1066_v23, 0.0  ;;  %v1075_v26 = vmul.f32 %v1066_v23, %v1066_v23 }
 0x7c2   :  { %v1068_v28 = vrot.slane %v1067_v25, 4 }
 0x7c3   :  { %v1076_v60 = vsel %vm546_vm0, %v1075_v26, 0.0 }
 0x7c4   :  { %v1069_v1 = vadd.f32 %v1068_v28, %v1067_v25  ;;  %v1077_v4 = vrot.slane %v1076_v60, 4 }
 0x7c6   :  { %v1070_v11 = vrot.slane %v1069_v1, 2  ;;  %v1078_v29 = vadd.f32 %v1077_v4, %v1076_v60 }
 0x7c8   :  { %v1071_v15 = vadd.f32 %v1070_v11, %v1069_v1  ;;  %v1079_v31 = vrot.slane %v1078_v29, 2 }
 0x7ca   :  { %v1072_v33 = vrot.slane %v1071_v15, 1  ;;  %v1080_v34 = vadd.f32 %v1079_v31, %v1078_v29 }
 0x7cc   :  { %v1073_v36 = vadd.f32 %v1072_v33, %v1071_v15  ;;  %v1081_v37 = vrot.slane %v1080_v34, 1 }
 0x7ce   :  { %v1074_v40 = vadd.f32 %v1073_v36, %v553_v35  ;;  %v1082_v41 = vadd.f32 %v1081_v37, %v1080_v34 }
 0x7d0   :  { %v1083_v49 = vadd.f32 %v1082_v41, %v562_v39  ;;  %v1085_v43 = vadd.f32 %v1084_v38, %v1074_v40 }
 0x7d2   :  { %1087 = vst.msk [vmem:[%s1813_s6] sm:$0x1] %vm28_vm15, %v1085_v43  ;;  %v1089_v44 = vadd.f32 %v1088_v42, %v1083_v49 }
 0x7d4   :  { %1090 = vst.msk [vmem:[%s1814_s7] sm:$0x1] %vm28_vm15, %v1089_v44 }

// kernel: tile.54
= control target key start
LH: loop header
LB: loop body
LE: loop exit
PB: predicated region body
PF: predicated region fallthrough
CT: control target
= control target key end

     0   :  { %vm7_vm0 = vcmask 130048   ;;  %s37_s8 = smov 16   ;;  %s38_s9 = smov 32   ;;  %vm13_vm1 = vcmask 523648   ;;  %vm19_vm2 = vcmask 392448   ;;  %vm25_vm3 = vcmask 261248   ;;  %s55_s0 = inlined_call_operand.vmem [shape: f32[4,16], index: 0, kind: input, shape index: {}]   ;;  %s56_s1 = inlined_call_operand.vmem [shape: f32[1,64], index: 1, kind: output, shape index: {}]  }
   0x1   :  { %v4_v0 = vld [vmem:[%s55_s0] sm:$0xf]  ;;  %s36_s0 = smov 48  }
   0x2   :  { %5 = vst [vmem:[#allocation1] sm:$0xf] %v4_v0 }
   0x9   :  { %v10_v1 = vld [vmem:[#allocation1 + $0x3] sm:$0x1]   ;;  %v22_v2 = vld [vmem:[#allocation1 + $0x1] sm:$0x1]   ;;  %v6_v3 = vld [vmem:[#allocation1] sm:$0x1]  }
   0xa   :  { %11 = vrot.lane.b32.xlu0 %v10_v1, %s36_s0  ;;  %23 = vrot.lane.b32.xlu1 %v22_v2, %s37_s8  ;;  %v16_v4 = vld [vmem:[#allocation1 + $0x2] sm:$0x1]   ;;  %8 = vst.msk [vmem:[#allocation0] sm:$0x1] %vm7_vm0, %v6_v3  }
   0xe   :  { %17 = vrot.lane.b32.xlu0 %v16_v4, %s38_s9 }
  0x7c   :  { %v12_v5 = vpop.permute.xlu0 %11   ;;  %v24_v6 = vpop.permute.xlu1 %23  }
  0x7d   :  { %14 = vst.msk [vmem:[#allocation0] sm:$0x1] %vm13_vm1, %v12_v5  }
  0x80   :  { %v18_v7 = vpop.permute.xlu0 %17  }
  0x81   :  { %20 = vst.msk [vmem:[#allocation0] sm:$0x1] %vm19_vm2, %v18_v7  }
  0x82   :  { %26 = vst.msk [vmem:[#allocation0] sm:$0x1] %vm25_vm3, %v24_v6  }
  0x89   :  { %v30_v8 = vld [vmem:[#allocation0] sm:$0x1] }
  0x8a   :  { %32 = vst [vmem:[%s56_s1] sm:$0x1] %v30_v8 }

// kernel: cnn_in_polar_coords.7
= control target key start
LH: loop header
LB: loop body
LE: loop exit
PB: predicated region body
PF: predicated region fallthrough
CT: control target
= control target key end

     0   :  { %s291_s12 = smov 0   ;;  %s308_s0 = inlined_call_operand.vmem [shape: bf16[2,3,64], index: 0, kind: input, shape index: {}]   ;;  %s309_s1 = inlined_call_operand.vmem [shape: f32[1,64], index: 1, kind: input, shape index: {}]   ;;  %s310_s2 = inlined_call_operand.vmem [shape: f32[1,64], index: 2, kind: input, shape index: {}]   ;;  %s311_s3 = inlined_call_operand.vmem [shape: bf16[2,3,64], index: 3, kind: output, shape index: {}]  }
   0x1 LB: > { %s244_s13 = sadd.s32 4294967295, %s269_s12   ;;  %p248_p0 = scmp.ge.s32.totalorder %s269_s12, 1  ;;  %s269_s12 = sphi %s291_s12, %s13_s12  }
   0x2   : > { %p136_p1 = scmp.lt.s32.totalorder %s269_s12, 3 }
   0x4   : > { %p137_p2 = pnand %p248_p0, %p136_p1 }
   0x5   : > { %p158_p3 = scmp.lt.s32.totalorder (!%p137_p2), %s244_s13, 1  ;;  %v251_v1 = vld [vmem:[%s309_s1] ss:$0 sm:$0xff] (!%p137_p2)  ;;  %vm185_vm0 = vcmask (!%p137_p2), 517120   ;;  %vm186_vm1 = vsmask.f32 (!%p137_p2), 1280 }
   0x6   : > { %140 = sbr.rel (%p137_p2) target bundleno = 27 (0x1b), region = 32  ;;  %v252_v3 = vld [vmem:[%s310_s2] ss:$0 sm:$0xff] (!%p137_p2)  ;;  %vm187_vm2 = vmand (!%p137_p2), %vm185_vm0, %vm186_vm1 }
   0xd   : > { %s313_s13 = smov (!%p158_p3, %s244_s13), 1 }
   0xe   : > { %s249_s14 = sshll.u32 %s313_s13, 1 }
   0xf   : > { %s161_s17 = scalar_lea.vmem %s308_s0, %s249_s14  ;;  %s165_s24 = scalar_lea.vmem %s311_s3, %s249_s14 }
  0x10   : > { %v166_v0 = vld [vmem:[%s161_s17] sm:$0x3] }
  0x11   : > { %v167_v2 = vunpack.c.l.bf16 %v166_v0  ;;  %v188_v6 = vld [vmem:[%s165_s24] sm:$0x3] }
  0x13   : > { %v175_v4 = vmul.f32 %v251_v1, %v167_v2 }
  0x15   : > { %v183_v5 = vadd.f32 %v252_v3, %v175_v4 }
  0x17   : > { %v184_v7 = vpack.c.bf16 %v183_v5, %v183_v5 }
  0x19   : > { %v189_v8 = vsel %vm187_vm2, %v184_v7, %v188_v6 }
  0x1a   : > { %190 = vst [vmem:[%s165_s24] sm:$0x3] %v189_v8 }
  0x1b PF: > { %s13_s12 = sadd.s32 1, %s269_s12  }
  0x1c   : > { %p10_p4 = scmp.ge.s32.totalorder %s13_s12, 4  }
  0x1e   :  { %12 = sbr.rel (!%p10_p4) target bundleno = 1 (0x1), region = 62 }

</bundles_post_ra>
